<compile_context>
chip_gen: v7x
topology: tpu7x:2x2x1
jax: 0.10.0
libtpu: 0.0.40
codegen_flags: <defaults>
</compile_context>

<pallas_src>
import functools

import numpy as np

import jax
import jax.numpy as jnp
from jax.experimental import pallas as pl
from jax.experimental.pallas import tpu as pltpu


# ---------------------------------------------------------------------------
# Fused forward kernel: concat'd input -> nb_blocks residual blocks -> head
# ---------------------------------------------------------------------------
def _fused_tcn_encoder_kernel(*refs, meta, tap_plans, L, Tp):
    # ---- unpack (in_refs..., out_ref) ----
    idx = 0
    h0_ref = refs[idx]; idx += 1
    block_refs = []
    for m in meta:
        n = 6 if m["has_downsample"] else 4
        block_refs.append(refs[idx:idx + n]); idx += n
    s_ref = refs[idx]          # (NS, B*T, B*T)  stacked causal shift matrices
    whead_ref = refs[idx + 1]  # (Tp, 2L, C)     per-pooled-slot head weights
    bhead_ref = refs[idx + 2]  # (2L, 1)
    psel_ref = refs[idx + 3]   # (Tp, B*T, B)    pooling selector matrices
    out_ref = refs[idx + 4]    # (2L, B)

    def causal_conv(x, w_ref, b_ref, plan):
        # x: (Cin, B*T) value.  plan: static tuple of (tap k, action) with
        # action == -1 -> shift 0, None -> shift >= T (zero contribution),
        # otherwise index into the stacked shift matrices.
        acc = None
        for k, action in plan:
            if action is None:
                continue                                   # tap falls fully in the causal pad
            if action == -1:
                xk = x
            else:
                xk = jnp.dot(x, s_ref[action],
                             preferred_element_type=jnp.float32)
            term = jnp.dot(w_ref[k], xk, preferred_element_type=jnp.float32)
            acc = term if acc is None else acc + term
        if acc is None:
            acc = jnp.zeros((w_ref.shape[1], x.shape[1]), jnp.float32)
        return acc + b_ref[...]                            # (Cout,1) lane-broadcast

    h = h0_ref[...]                                        # (Cin0, B*T), stays in vregs
    for m, brefs, plan in zip(meta, block_refs, tap_plans):
        if m["has_downsample"]:
            w1, b1, w2, b2, wd, bd = brefs
        else:
            w1, b1, w2, b2 = brefs
        # tcn1: causal conv -> ReLU   (dropout = identity in eval mode)
        a = jnp.maximum(causal_conv(h, w1, b1, plan), 0.0)
        # tcn2: causal conv -> ReLU only if not the last block
        a = causal_conv(a, w2, b2, plan)
        if not m["last"]:
            a = jnp.maximum(a, 0.0)
        # TODO(synk): dropout with p>0 in training mode not implemented
        #             (eval-mode identity).
        if m["has_downsample"]:
            res = jnp.dot(wd[...], h, preferred_element_type=jnp.float32) + bd[...]
        else:
            res = h
        h = a + res                                        # (Cout, B*T)

    # ---- head: avgpool + flatten + [mu;logvar] folded into Tp MXU steps ----
    acc = None
    for tp in range(Tp):
        pooled_tp = jnp.dot(h, psel_ref[tp],
                            preferred_element_type=jnp.float32)        # (C, B)
        term = jnp.dot(whead_ref[tp], pooled_tp,
                       preferred_element_type=jnp.float32)             # (2L, B)
        acc = term if acc is None else acc + term
    out_ref[...] = acc + bhead_ref[...]                                 # (2L, B)


def _full_spec(shape):
    nd = len(shape)
    return pl.BlockSpec(shape, lambda i, _nd=nd: (0,) * _nd)


def tcn_encoder_forward(params, x, labels, *, meta, kernel_size, avgpoolnum):
    """Fused TCN_encoder forward: one pallas_call for the whole module."""
    B, _, T = x.shape
    # Input prep (layout plumbing only): channel concat + lane-dense (C, B*T).
    h0 = jnp.concatenate([x, labels], axis=1)              # (B, Cin0, T)
    Cin0 = h0.shape[1]
    h0 = jnp.transpose(h0, (1, 0, 2)).reshape(Cin0, B * T)  # (Cin0, B*T)

    K = kernel_size
    P = avgpoolnum
    Tp = T // P
    L = params["bhead"].shape[0] // 2
    BT = B * T

    # ---- static tap plans + deduplicated causal shift matrices -------------
    shift_to_idx = {}
    tap_plans = []
    for m in meta:
        d = m["dilation"]
        plan = []
        for k in range(K):
            shift = (K - 1 - k) * d
            if shift == 0:
                plan.append((k, -1))
            elif shift >= T:
                plan.append((k, None))                     # statically zero
            else:
                if shift not in shift_to_idx:
                    shift_to_idx[shift] = len(shift_to_idx)
                plan.append((k, shift_to_idx[shift]))
        tap_plans.append(tuple(plan))
    ns = max(len(shift_to_idx), 1)
    s_all = np.zeros((ns, BT, BT), np.float32)
    for shift, si in shift_to_idx.items():
        for i in range(BT):
            j = i + shift
            if j < BT and (i // T) == (j // T):            # causal, per-batch segment
                s_all[si, i, j] = 1.0
    s_all = jnp.asarray(s_all)

    # ---- pooling selectors: (h @ psel[tp])[c, b] = mean_p h[b, c, tp*P+p] ---
    psel = np.zeros((Tp, BT, B), np.float32)
    for tp in range(Tp):
        for b in range(B):
            for p in range(P):
                psel[tp, b * T + tp * P + p, b] = 1.0 / P
    psel = jnp.asarray(psel)

    args = [h0]
    in_specs = [_full_spec(h0.shape)]
    for bp, m in zip(params["blocks"], meta):
        names = ("w1", "b1", "w2", "b2") + (("wd", "bd") if m["has_downsample"] else ())
        for nm in names:
            args.append(bp[nm])
            in_specs.append(_full_spec(bp[nm].shape))
    for arr in (s_all, params["whead"], params["bhead"], psel):
        args.append(arr)
        in_specs.append(_full_spec(arr.shape))

    kernel = functools.partial(_fused_tcn_encoder_kernel, meta=meta,
                               tap_plans=tuple(tap_plans), L=L, Tp=Tp)
    out_t = pl.pallas_call(
        kernel,
        out_shape=jax.ShapeDtypeStruct((2 * L, B), jnp.float32),
        grid=(1,),
        in_specs=in_specs,
        out_specs=_full_spec((2 * L, B)),
        compiler_params=pltpu.CompilerParams(dimension_semantics=("arbitrary",)),
    )(*args)
    # (2L, B) -> (B, L) twice: trivial wrapper-side layout plumbing.
    mu = out_t[:L, :].T
    log_var = out_t[L:, :].T
    return mu, log_var


# ---------------------------------------------------------------------------
# Parameter init (synthetic, deterministic) + head-weight folding
# ---------------------------------------------------------------------------
def init_params(key, initial_channels, latent_channels, latent_dim,
                kernel_size, nb_blocks, seq_len, avgpoolnum, dilatation):
    P = avgpoolnum
    Tp = seq_len // P
    dense_dim = latent_channels * Tp
    chans = [initial_channels + 1] + [latent_channels] * nb_blocks
    scale = 0.2   # synthetic deterministic init (module uses normal(0, 0.01))

    blocks, meta = [], []
    for j in range(nb_blocks):
        cin, cout = chans[j], chans[j + 1]
        d = dilatation ** j
        key, k1, k2, k3, k4, k5, k6 = jax.random.split(key, 7)
        bp = {
            # tap-form conv weights: w[k, o, c]
            "w1": scale * jax.random.normal(k1, (kernel_size, cout, cin), jnp.float32),
            "b1": scale * jax.random.normal(k2, (cout, 1), jnp.float32),
            "w2": scale * jax.random.normal(k3, (kernel_size, cout, cout), jnp.float32),
            "b2": scale * jax.random.normal(k4, (cout, 1), jnp.float32),
        }
        has_ds = cin != cout
        if has_ds:
            bp["wd"] = scale * jax.random.normal(k5, (cout, cin), jnp.float32)
            bp["bd"] = scale * jax.random.normal(k6, (cout, 1), jnp.float32)
        blocks.append(bp)
        meta.append({"cin": cin, "cout": cout, "dilation": d,
                     "has_downsample": has_ds, "last": j == nb_blocks - 1})

    key, km, kmb, kv, kvb = jax.random.split(key, 5)
    wmu = scale * jax.random.normal(km, (latent_dim, dense_dim), jnp.float32)
    wlv = scale * jax.random.normal(kv, (latent_dim, dense_dim), jnp.float32)
    bmu = scale * jax.random.normal(kmb, (latent_dim,), jnp.float32)
    blv = scale * jax.random.normal(kvb, (latent_dim,), jnp.float32)

    # Fold Flatten (torch order: index c*Tp + tp) + [W_mu ; W_logvar] into
    # per-pooled-time-slot (2L, C) slices:  whead[tp, l, c] = wcat[l, c*Tp+tp].
    wcat = jnp.concatenate([wmu, wlv], axis=0)                        # (2L, C*Tp)
    whead = wcat.reshape(2 * latent_dim, latent_channels, Tp).transpose(2, 0, 1)
    bhead = jnp.concatenate([bmu, blv], axis=0).reshape(2 * latent_dim, 1)

    params = {
        "blocks": blocks,
        "whead": whead, "bhead": bhead,
        # raw head params kept for the pure-JAX reference
        "wmu": wmu, "wlv": wlv, "bmu": bmu, "blv": blv,
    }
    return params, meta


# ---------------------------------------------------------------------------
# Pure-JAX reference (for correctness check)
# ---------------------------------------------------------------------------
def _ref_causal_conv(x, w_koc, b, dilation):
    K = w_koc.shape[0]
    T = x.shape[-1]
    pad = (K - 1) * dilation
    xp = jnp.pad(x, ((0, 0), (0, 0), (pad, 0)))
    out = jnp.zeros((x.shape[0], w_koc.shape[1], T), jnp.float32)
    for k in range(K):
        out = out + jnp.einsum('oc,bct->bot', w_koc[k],
                               xp[:, :, k * dilation:k * dilation + T],
                               precision=jax.lax.Precision.HIGHEST)
    return out + b[None]


def reference_forward(params, meta, x, labels, *, avgpoolnum):
    h = jnp.concatenate([x, labels], axis=1)
    for bp, m in zip(params["blocks"], meta):
        d = m["dilation"]
        o = jax.nn.relu(_ref_causal_conv(h, bp["w1"], bp["b1"], d))
        o = _ref_causal_conv(o, bp["w2"], bp["b2"], d)
        if not m["last"]:
            o = jax.nn.relu(o)
        res = h
        if m["has_downsample"]:
            res = jnp.einsum('oc,bct->bot', bp["wd"], h,
                             precision=jax.lax.Precision.HIGHEST) + bp["bd"][None]
        h = o + res
    B, C, T = h.shape
    P = avgpoolnum
    Tp = T // P
    pooled = h[:, :, :Tp * P].reshape(B, C, Tp, P).mean(-1)
    flat = pooled.reshape(B, C * Tp)
    mu = jnp.dot(flat, params["wmu"].T,
                 precision=jax.lax.Precision.HIGHEST) + params["bmu"][None, :]
    lv = jnp.dot(flat, params["wlv"].T,
                 precision=jax.lax.Precision.HIGHEST) + params["blv"][None, :]
    return mu, lv


if __name__ == "__main__":
    key = jax.random.PRNGKey(0)

    B = 2
    initial_channels = 3
    latent_channels = 8
    latent_dim = 4
    kernel_size = 3
    stride = 1            # assumed 1 (required for the residual add)
    dilatation = 2
    dropout = 0.0         # eval-mode identity
    nb_blocks = 3
    avgpoolnum = 2
    seq_len = 16

    kx, kl, kp = jax.random.split(key, 3)
    x = jax.random.normal(kx, (B, initial_channels, seq_len), jnp.float32)
    labels = jax.random.normal(kl, (B, 1, seq_len), jnp.float32)

    params, meta = init_params(kp, initial_channels, latent_channels,
                               latent_dim, kernel_size, nb_blocks, seq_len,
                               avgpoolnum, dilatation)

    fwd = jax.jit(lambda p, xa, la: tcn_encoder_forward(
        p, xa, la, meta=meta, kernel_size=kernel_size, avgpoolnum=avgpoolnum))
    mu, log_var = fwd(params, x, labels)
    jax.block_until_ready((mu, log_var))

    mu_r, lv_r = reference_forward(params, meta, x, labels,
                                   avgpoolnum=avgpoolnum)
    assert mu.shape == (B, latent_dim) and log_var.shape == (B, latent_dim)
    assert jnp.allclose(mu, mu_r, atol=1e-3, rtol=1e-3), "mu mismatch"
    assert jnp.allclose(log_var, lv_r, atol=1e-3, rtol=1e-3), "log_var mismatch"

    print("KERNEL_OK")
</pallas_src>

<mosaic_0001>
module attributes {stable_mosaic.version = 11 : i64} {
  func.func @_fused_tcn_encoder_kernel(%arg0: i32, %arg1: memref<4x32xf32, #tpu.memory_space<vmem>>, %arg2: memref<3x8x4xf32, #tpu.memory_space<vmem>>, %arg3: memref<8x1xf32, #tpu.memory_space<vmem>>, %arg4: memref<3x8x8xf32, #tpu.memory_space<vmem>>, %arg5: memref<8x1xf32, #tpu.memory_space<vmem>>, %arg6: memref<8x4xf32, #tpu.memory_space<vmem>>, %arg7: memref<8x1xf32, #tpu.memory_space<vmem>>, %arg8: memref<3x8x8xf32, #tpu.memory_space<vmem>>, %arg9: memref<8x1xf32, #tpu.memory_space<vmem>>, %arg10: memref<3x8x8xf32, #tpu.memory_space<vmem>>, %arg11: memref<8x1xf32, #tpu.memory_space<vmem>>, %arg12: memref<3x8x8xf32, #tpu.memory_space<vmem>>, %arg13: memref<8x1xf32, #tpu.memory_space<vmem>>, %arg14: memref<3x8x8xf32, #tpu.memory_space<vmem>>, %arg15: memref<8x1xf32, #tpu.memory_space<vmem>>, %arg16: memref<4x32x32xf32, #tpu.memory_space<vmem>>, %arg17: memref<8x8x8xf32, #tpu.memory_space<vmem>>, %arg18: memref<8x1xf32, #tpu.memory_space<vmem>>, %arg19: memref<8x32x2xf32, #tpu.memory_space<vmem>>, %arg20: memref<8x2xf32, #tpu.memory_space<vmem>>) attributes {dimension_semantics = [#tpu.dimension_semantics<arbitrary>], iteration_bounds = array<i64: 1>, scalar_prefetch = 0 : i64, scratch_operands = 0 : i64, tpu.core_type = #tpu.core_type<tc>, window_params = [{pipeline_mode = #tpu.pipeline_mode<synchronous>, transform_indices = @transform_0, window_bounds = array<i64: 4, 32>}, {pipeline_mode = #tpu.pipeline_mode<synchronous>, transform_indices = @transform_1, window_bounds = array<i64: 3, 8, 4>}, {pipeline_mode = #tpu.pipeline_mode<synchronous>, transform_indices = @transform_2, window_bounds = array<i64: 8, 1>}, {pipeline_mode = #tpu.pipeline_mode<synchronous>, transform_indices = @transform_3, window_bounds = array<i64: 3, 8, 8>}, {pipeline_mode = #tpu.pipeline_mode<synchronous>, transform_indices = @transform_4, window_bounds = array<i64: 8, 1>}, {pipeline_mode = #tpu.pipeline_mode<synchronous>, transform_indices = @transform_5, window_bounds = array<i64: 8, 4>}, {pipeline_mode = #tpu.pipeline_mode<synchronous>, transform_indices = @transform_6, window_bounds = array<i64: 8, 1>}, {pipeline_mode = #tpu.pipeline_mode<synchronous>, transform_indices = @transform_7, window_bounds = array<i64: 3, 8, 8>}, {pipeline_mode = #tpu.pipeline_mode<synchronous>, transform_indices = @transform_8, window_bounds = array<i64: 8, 1>}, {pipeline_mode = #tpu.pipeline_mode<synchronous>, transform_indices = @transform_9, window_bounds = array<i64: 3, 8, 8>}, {pipeline_mode = #tpu.pipeline_mode<synchronous>, transform_indices = @transform_10, window_bounds = array<i64: 8, 1>}, {pipeline_mode = #tpu.pipeline_mode<synchronous>, transform_indices = @transform_11, window_bounds = array<i64: 3, 8, 8>}, {pipeline_mode = #tpu.pipeline_mode<synchronous>, transform_indices = @transform_12, window_bounds = array<i64: 8, 1>}, {pipeline_mode = #tpu.pipeline_mode<synchronous>, transform_indices = @transform_13, window_bounds = array<i64: 3, 8, 8>}, {pipeline_mode = #tpu.pipeline_mode<synchronous>, transform_indices = @transform_14, window_bounds = array<i64: 8, 1>}, {pipeline_mode = #tpu.pipeline_mode<synchronous>, transform_indices = @transform_15, window_bounds = array<i64: 4, 32, 32>}, {pipeline_mode = #tpu.pipeline_mode<synchronous>, transform_indices = @transform_16, window_bounds = array<i64: 8, 8, 8>}, {pipeline_mode = #tpu.pipeline_mode<synchronous>, transform_indices = @transform_17, window_bounds = array<i64: 8, 1>}, {pipeline_mode = #tpu.pipeline_mode<synchronous>, transform_indices = @transform_18, window_bounds = array<i64: 8, 32, 2>}, {pipeline_mode = #tpu.pipeline_mode<synchronous>, transform_indices = @transform_19, window_bounds = array<i64: 8, 2>}]} {
    %c0 = arith.constant 0 : index
    %c0_0 = arith.constant 0 : index
    %0 = vector.load %arg1[%c0, %c0_0] : memref<4x32xf32, #tpu.memory_space<vmem>>, vector<4x32xf32>
    %c0_1 = arith.constant 0 : index
    %c0_2 = arith.constant 0 : index
    %c0_3 = arith.constant 0 : index
    %1 = vector.load %arg16[%c0_1, %c0_2, %c0_3] : memref<4x32x32xf32, #tpu.memory_space<vmem>>, vector<1x32x32xf32>
    %2 = vector.shape_cast %1 : vector<1x32x32xf32> to vector<32x32xf32>
    %cst = arith.constant dense<0.000000e+00> : vector<4x32xf32>
    %3 = tpu.matmul %0, %2, %cst {dimension_numbers = #tpu.dot_dimension_numbers<[1], [0], [0], [1], [0, 0, 1, 1], [], []>} : vector<4x32xf32>, vector<32x32xf32>, vector<4x32xf32> -> vector<4x32xf32>
    %c0_4 = arith.constant 0 : index
    %c0_5 = arith.constant 0 : index
    %c0_6 = arith.constant 0 : index
    %4 = vector.load %arg2[%c0_4, %c0_5, %c0_6] : memref<3x8x4xf32, #tpu.memory_space<vmem>>, vector<1x8x4xf32>
    %5 = vector.shape_cast %4 : vector<1x8x4xf32> to vector<8x4xf32>
    %cst_7 = arith.constant dense<0.000000e+00> : vector<8x32xf32>
    %6 = tpu.matmul %5, %3, %cst_7 {dimension_numbers = #tpu.dot_dimension_numbers<[1], [0], [0], [1], [0, 0, 1, 1], [], []>} : vector<8x4xf32>, vector<4x32xf32>, vector<8x32xf32> -> vector<8x32xf32>
    %c1 = arith.constant 1 : index
    %c0_8 = arith.constant 0 : index
    %c0_9 = arith.constant 0 : index
    %7 = vector.load %arg16[%c1, %c0_8, %c0_9] : memref<4x32x32xf32, #tpu.memory_space<vmem>>, vector<1x32x32xf32>
    %8 = vector.shape_cast %7 : vector<1x32x32xf32> to vector<32x32xf32>
    %cst_10 = arith.constant dense<0.000000e+00> : vector<4x32xf32>
    %9 = tpu.matmul %0, %8, %cst_10 {dimension_numbers = #tpu.dot_dimension_numbers<[1], [0], [0], [1], [0, 0, 1, 1], [], []>} : vector<4x32xf32>, vector<32x32xf32>, vector<4x32xf32> -> vector<4x32xf32>
    %c1_11 = arith.constant 1 : index
    %c0_12 = arith.constant 0 : index
    %c0_13 = arith.constant 0 : index
    %10 = vector.load %arg2[%c1_11, %c0_12, %c0_13] : memref<3x8x4xf32, #tpu.memory_space<vmem>>, vector<1x8x4xf32>
    %11 = vector.shape_cast %10 : vector<1x8x4xf32> to vector<8x4xf32>
    %cst_14 = arith.constant dense<0.000000e+00> : vector<8x32xf32>
    %12 = tpu.matmul %11, %9, %cst_14 {dimension_numbers = #tpu.dot_dimension_numbers<[1], [0], [0], [1], [0, 0, 1, 1], [], []>} : vector<8x4xf32>, vector<4x32xf32>, vector<8x32xf32> -> vector<8x32xf32>
    %13 = arith.addf %6, %12 : vector<8x32xf32>
    %c2 = arith.constant 2 : index
    %c0_15 = arith.constant 0 : index
    %c0_16 = arith.constant 0 : index
    %14 = vector.load %arg2[%c2, %c0_15, %c0_16] : memref<3x8x4xf32, #tpu.memory_space<vmem>>, vector<1x8x4xf32>
    %15 = vector.shape_cast %14 : vector<1x8x4xf32> to vector<8x4xf32>
    %cst_17 = arith.constant dense<0.000000e+00> : vector<8x32xf32>
    %16 = tpu.matmul %15, %0, %cst_17 {dimension_numbers = #tpu.dot_dimension_numbers<[1], [0], [0], [1], [0, 0, 1, 1], [], []>} : vector<8x4xf32>, vector<4x32xf32>, vector<8x32xf32> -> vector<8x32xf32>
    %17 = arith.addf %13, %16 : vector<8x32xf32>
    %c0_18 = arith.constant 0 : index
    %c0_19 = arith.constant 0 : index
    %18 = vector.load %arg3[%c0_18, %c0_19] : memref<8x1xf32, #tpu.memory_space<vmem>>, vector<8x1xf32>
    %19 = vector.broadcast %18 : vector<8x1xf32> to vector<8x32xf32>
    %20 = arith.addf %17, %19 : vector<8x32xf32>
    %cst_20 = arith.constant 0.000000e+00 : f32
    %21 = vector.broadcast %cst_20 : f32 to vector<8x32xf32>
    %22 = arith.maximumf %20, %21 : vector<8x32xf32>
    %c0_21 = arith.constant 0 : index
    %c0_22 = arith.constant 0 : index
    %c0_23 = arith.constant 0 : index
    %23 = vector.load %arg16[%c0_21, %c0_22, %c0_23] : memref<4x32x32xf32, #tpu.memory_space<vmem>>, vector<1x32x32xf32>
    %24 = vector.shape_cast %23 : vector<1x32x32xf32> to vector<32x32xf32>
    %cst_24 = arith.constant dense<0.000000e+00> : vector<8x32xf32>
    %25 = tpu.matmul %22, %24, %cst_24 {dimension_numbers = #tpu.dot_dimension_numbers<[1], [0], [0], [1], [0, 0, 1, 1], [], []>} : vector<8x32xf32>, vector<32x32xf32>, vector<8x32xf32> -> vector<8x32xf32>
    %c0_25 = arith.constant 0 : index
    %c0_26 = arith.constant 0 : index
    %c0_27 = arith.constant 0 : index
    %26 = vector.load %arg4[%c0_25, %c0_26, %c0_27] : memref<3x8x8xf32, #tpu.memory_space<vmem>>, vector<1x8x8xf32>
    %27 = vector.shape_cast %26 : vector<1x8x8xf32> to vector<8x8xf32>
    %cst_28 = arith.constant dense<0.000000e+00> : vector<8x32xf32>
    %28 = tpu.matmul %27, %25, %cst_28 {dimension_numbers = #tpu.dot_dimension_numbers<[1], [0], [0], [1], [0, 0, 1, 1], [], []>} : vector<8x8xf32>, vector<8x32xf32>, vector<8x32xf32> -> vector<8x32xf32>
    %c1_29 = arith.constant 1 : index
    %c0_30 = arith.constant 0 : index
    %c0_31 = arith.constant 0 : index
    %29 = vector.load %arg16[%c1_29, %c0_30, %c0_31] : memref<4x32x32xf32, #tpu.memory_space<vmem>>, vector<1x32x32xf32>
    %30 = vector.shape_cast %29 : vector<1x32x32xf32> to vector<32x32xf32>
    %cst_32 = arith.constant dense<0.000000e+00> : vector<8x32xf32>
    %31 = tpu.matmul %22, %30, %cst_32 {dimension_numbers = #tpu.dot_dimension_numbers<[1], [0], [0], [1], [0, 0, 1, 1], [], []>} : vector<8x32xf32>, vector<32x32xf32>, vector<8x32xf32> -> vector<8x32xf32>
    %c1_33 = arith.constant 1 : index
    %c0_34 = arith.constant 0 : index
    %c0_35 = arith.constant 0 : index
    %32 = vector.load %arg4[%c1_33, %c0_34, %c0_35] : memref<3x8x8xf32, #tpu.memory_space<vmem>>, vector<1x8x8xf32>
    %33 = vector.shape_cast %32 : vector<1x8x8xf32> to vector<8x8xf32>
    %cst_36 = arith.constant dense<0.000000e+00> : vector<8x32xf32>
    %34 = tpu.matmul %33, %31, %cst_36 {dimension_numbers = #tpu.dot_dimension_numbers<[1], [0], [0], [1], [0, 0, 1, 1], [], []>} : vector<8x8xf32>, vector<8x32xf32>, vector<8x32xf32> -> vector<8x32xf32>
    %35 = arith.addf %28, %34 : vector<8x32xf32>
    %c2_37 = arith.constant 2 : index
    %c0_38 = arith.constant 0 : index
    %c0_39 = arith.constant 0 : index
    %36 = vector.load %arg4[%c2_37, %c0_38, %c0_39] : memref<3x8x8xf32, #tpu.memory_space<vmem>>, vector<1x8x8xf32>
    %37 = vector.shape_cast %36 : vector<1x8x8xf32> to vector<8x8xf32>
    %cst_40 = arith.constant dense<0.000000e+00> : vector<8x32xf32>
    %38 = tpu.matmul %37, %22, %cst_40 {dimension_numbers = #tpu.dot_dimension_numbers<[1], [0], [0], [1], [0, 0, 1, 1], [], []>} : vector<8x8xf32>, vector<8x32xf32>, vector<8x32xf32> -> vector<8x32xf32>
    %39 = arith.addf %35, %38 : vector<8x32xf32>
    %c0_41 = arith.constant 0 : index
    %c0_42 = arith.constant 0 : index
    %40 = vector.load %arg5[%c0_41, %c0_42] : memref<8x1xf32, #tpu.memory_space<vmem>>, vector<8x1xf32>
    %41 = vector.broadcast %40 : vector<8x1xf32> to vector<8x32xf32>
    %42 = arith.addf %39, %41 : vector<8x32xf32>
    %cst_43 = arith.constant 0.000000e+00 : f32
    %43 = vector.broadcast %cst_43 : f32 to vector<8x32xf32>
    %44 = arith.maximumf %42, %43 : vector<8x32xf32>
    %c0_44 = arith.constant 0 : index
    %c0_45 = arith.constant 0 : index
    %45 = vector.load %arg6[%c0_44, %c0_45] : memref<8x4xf32, #tpu.memory_space<vmem>>, vector<8x4xf32>
    %cst_46 = arith.constant dense<0.000000e+00> : vector<8x32xf32>
    %46 = tpu.matmul %45, %0, %cst_46 {dimension_numbers = #tpu.dot_dimension_numbers<[1], [0], [0], [1], [0, 0, 1, 1], [], []>} : vector<8x4xf32>, vector<4x32xf32>, vector<8x32xf32> -> vector<8x32xf32>
    %c0_47 = arith.constant 0 : index
    %c0_48 = arith.constant 0 : index
    %47 = vector.load %arg7[%c0_47, %c0_48] : memref<8x1xf32, #tpu.memory_space<vmem>>, vector<8x1xf32>
    %48 = vector.broadcast %47 : vector<8x1xf32> to vector<8x32xf32>
    %49 = arith.addf %46, %48 : vector<8x32xf32>
    %50 = arith.addf %44, %49 : vector<8x32xf32>
    %c2_49 = arith.constant 2 : index
    %c0_50 = arith.constant 0 : index
    %c0_51 = arith.constant 0 : index
    %51 = vector.load %arg16[%c2_49, %c0_50, %c0_51] : memref<4x32x32xf32, #tpu.memory_space<vmem>>, vector<1x32x32xf32>
    %52 = vector.shape_cast %51 : vector<1x32x32xf32> to vector<32x32xf32>
    %cst_52 = arith.constant dense<0.000000e+00> : vector<8x32xf32>
    %53 = tpu.matmul %50, %52, %cst_52 {dimension_numbers = #tpu.dot_dimension_numbers<[1], [0], [0], [1], [0, 0, 1, 1], [], []>} : vector<8x32xf32>, vector<32x32xf32>, vector<8x32xf32> -> vector<8x32xf32>
    %c0_53 = arith.constant 0 : index
    %c0_54 = arith.constant 0 : index
    %c0_55 = arith.constant 0 : index
    %54 = vector.load %arg8[%c0_53, %c0_54, %c0_55] : memref<3x8x8xf32, #tpu.memory_space<vmem>>, vector<1x8x8xf32>
    %55 = vector.shape_cast %54 : vector<1x8x8xf32> to vector<8x8xf32>
    %cst_56 = arith.constant dense<0.000000e+00> : vector<8x32xf32>
    %56 = tpu.matmul %55, %53, %cst_56 {dimension_numbers = #tpu.dot_dimension_numbers<[1], [0], [0], [1], [0, 0, 1, 1], [], []>} : vector<8x8xf32>, vector<8x32xf32>, vector<8x32xf32> -> vector<8x32xf32>
    %c0_57 = arith.constant 0 : index
    %c0_58 = arith.constant 0 : index
    %c0_59 = arith.constant 0 : index
    %57 = vector.load %arg16[%c0_57, %c0_58, %c0_59] : memref<4x32x32xf32, #tpu.memory_space<vmem>>, vector<1x32x32xf32>
    %58 = vector.shape_cast %57 : vector<1x32x32xf32> to vector<32x32xf32>
    %cst_60 = arith.constant dense<0.000000e+00> : vector<8x32xf32>
    %59 = tpu.matmul %50, %58, %cst_60 {dimension_numbers = #tpu.dot_dimension_numbers<[1], [0], [0], [1], [0, 0, 1, 1], [], []>} : vector<8x32xf32>, vector<32x32xf32>, vector<8x32xf32> -> vector<8x32xf32>
    %c1_61 = arith.constant 1 : index
    %c0_62 = arith.constant 0 : index
    %c0_63 = arith.constant 0 : index
    %60 = vector.load %arg8[%c1_61, %c0_62, %c0_63] : memref<3x8x8xf32, #tpu.memory_space<vmem>>, vector<1x8x8xf32>
    %61 = vector.shape_cast %60 : vector<1x8x8xf32> to vector<8x8xf32>
    %cst_64 = arith.constant dense<0.000000e+00> : vector<8x32xf32>
    %62 = tpu.matmul %61, %59, %cst_64 {dimension_numbers = #tpu.dot_dimension_numbers<[1], [0], [0], [1], [0, 0, 1, 1], [], []>} : vector<8x8xf32>, vector<8x32xf32>, vector<8x32xf32> -> vector<8x32xf32>
    %63 = arith.addf %56, %62 : vector<8x32xf32>
    %c2_65 = arith.constant 2 : index
    %c0_66 = arith.constant 0 : index
    %c0_67 = arith.constant 0 : index
    %64 = vector.load %arg8[%c2_65, %c0_66, %c0_67] : memref<3x8x8xf32, #tpu.memory_space<vmem>>, vector<1x8x8xf32>
    %65 = vector.shape_cast %64 : vector<1x8x8xf32> to vector<8x8xf32>
    %cst_68 = arith.constant dense<0.000000e+00> : vector<8x32xf32>
    %66 = tpu.matmul %65, %50, %cst_68 {dimension_numbers = #tpu.dot_dimension_numbers<[1], [0], [0], [1], [0, 0, 1, 1], [], []>} : vector<8x8xf32>, vector<8x32xf32>, vector<8x32xf32> -> vector<8x32xf32>
    %67 = arith.addf %63, %66 : vector<8x32xf32>
    %c0_69 = arith.constant 0 : index
    %c0_70 = arith.constant 0 : index
    %68 = vector.load %arg9[%c0_69, %c0_70] : memref<8x1xf32, #tpu.memory_space<vmem>>, vector<8x1xf32>
    %69 = vector.broadcast %68 : vector<8x1xf32> to vector<8x32xf32>
    %70 = arith.addf %67, %69 : vector<8x32xf32>
    %cst_71 = arith.constant 0.000000e+00 : f32
    %71 = vector.broadcast %cst_71 : f32 to vector<8x32xf32>
    %72 = arith.maximumf %70, %71 : vector<8x32xf32>
    %c2_72 = arith.constant 2 : index
    %c0_73 = arith.constant 0 : index
    %c0_74 = arith.constant 0 : index
    %73 = vector.load %arg16[%c2_72, %c0_73, %c0_74] : memref<4x32x32xf32, #tpu.memory_space<vmem>>, vector<1x32x32xf32>
    %74 = vector.shape_cast %73 : vector<1x32x32xf32> to vector<32x32xf32>
    %cst_75 = arith.constant dense<0.000000e+00> : vector<8x32xf32>
    %75 = tpu.matmul %72, %74, %cst_75 {dimension_numbers = #tpu.dot_dimension_numbers<[1], [0], [0], [1], [0, 0, 1, 1], [], []>} : vector<8x32xf32>, vector<32x32xf32>, vector<8x32xf32> -> vector<8x32xf32>
    %c0_76 = arith.constant 0 : index
    %c0_77 = arith.constant 0 : index
    %c0_78 = arith.constant 0 : index
    %76 = vector.load %arg10[%c0_76, %c0_77, %c0_78] : memref<3x8x8xf32, #tpu.memory_space<vmem>>, vector<1x8x8xf32>
    %77 = vector.shape_cast %76 : vector<1x8x8xf32> to vector<8x8xf32>
    %cst_79 = arith.constant dense<0.000000e+00> : vector<8x32xf32>
    %78 = tpu.matmul %77, %75, %cst_79 {dimension_numbers = #tpu.dot_dimension_numbers<[1], [0], [0], [1], [0, 0, 1, 1], [], []>} : vector<8x8xf32>, vector<8x32xf32>, vector<8x32xf32> -> vector<8x32xf32>
    %c0_80 = arith.constant 0 : index
    %c0_81 = arith.constant 0 : index
    %c0_82 = arith.constant 0 : index
    %79 = vector.load %arg16[%c0_80, %c0_81, %c0_82] : memref<4x32x32xf32, #tpu.memory_space<vmem>>, vector<1x32x32xf32>
    %80 = vector.shape_cast %79 : vector<1x32x32xf32> to vector<32x32xf32>
    %cst_83 = arith.constant dense<0.000000e+00> : vector<8x32xf32>
    %81 = tpu.matmul %72, %80, %cst_83 {dimension_numbers = #tpu.dot_dimension_numbers<[1], [0], [0], [1], [0, 0, 1, 1], [], []>} : vector<8x32xf32>, vector<32x32xf32>, vector<8x32xf32> -> vector<8x32xf32>
    %c1_84 = arith.constant 1 : index
    %c0_85 = arith.constant 0 : index
    %c0_86 = arith.constant 0 : index
    %82 = vector.load %arg10[%c1_84, %c0_85, %c0_86] : memref<3x8x8xf32, #tpu.memory_space<vmem>>, vector<1x8x8xf32>
    %83 = vector.shape_cast %82 : vector<1x8x8xf32> to vector<8x8xf32>
    %cst_87 = arith.constant dense<0.000000e+00> : vector<8x32xf32>
    %84 = tpu.matmul %83, %81, %cst_87 {dimension_numbers = #tpu.dot_dimension_numbers<[1], [0], [0], [1], [0, 0, 1, 1], [], []>} : vector<8x8xf32>, vector<8x32xf32>, vector<8x32xf32> -> vector<8x32xf32>
    %85 = arith.addf %78, %84 : vector<8x32xf32>
    %c2_88 = arith.constant 2 : index
    %c0_89 = arith.constant 0 : index
    %c0_90 = arith.constant 0 : index
    %86 = vector.load %arg10[%c2_88, %c0_89, %c0_90] : memref<3x8x8xf32, #tpu.memory_space<vmem>>, vector<1x8x8xf32>
    %87 = vector.shape_cast %86 : vector<1x8x8xf32> to vector<8x8xf32>
    %cst_91 = arith.constant dense<0.000000e+00> : vector<8x32xf32>
    %88 = tpu.matmul %87, %72, %cst_91 {dimension_numbers = #tpu.dot_dimension_numbers<[1], [0], [0], [1], [0, 0, 1, 1], [], []>} : vector<8x8xf32>, vector<8x32xf32>, vector<8x32xf32> -> vector<8x32xf32>
    %89 = arith.addf %85, %88 : vector<8x32xf32>
    %c0_92 = arith.constant 0 : index
    %c0_93 = arith.constant 0 : index
    %90 = vector.load %arg11[%c0_92, %c0_93] : memref<8x1xf32, #tpu.memory_space<vmem>>, vector<8x1xf32>
    %91 = vector.broadcast %90 : vector<8x1xf32> to vector<8x32xf32>
    %92 = arith.addf %89, %91 : vector<8x32xf32>
    %cst_94 = arith.constant 0.000000e+00 : f32
    %93 = vector.broadcast %cst_94 : f32 to vector<8x32xf32>
    %94 = arith.maximumf %92, %93 : vector<8x32xf32>
    %95 = arith.addf %94, %50 : vector<8x32xf32>
    %c3 = arith.constant 3 : index
    %c0_95 = arith.constant 0 : index
    %c0_96 = arith.constant 0 : index
    %96 = vector.load %arg16[%c3, %c0_95, %c0_96] : memref<4x32x32xf32, #tpu.memory_space<vmem>>, vector<1x32x32xf32>
    %97 = vector.shape_cast %96 : vector<1x32x32xf32> to vector<32x32xf32>
    %cst_97 = arith.constant dense<0.000000e+00> : vector<8x32xf32>
    %98 = tpu.matmul %95, %97, %cst_97 {dimension_numbers = #tpu.dot_dimension_numbers<[1], [0], [0], [1], [0, 0, 1, 1], [], []>} : vector<8x32xf32>, vector<32x32xf32>, vector<8x32xf32> -> vector<8x32xf32>
    %c0_98 = arith.constant 0 : index
    %c0_99 = arith.constant 0 : index
    %c0_100 = arith.constant 0 : index
    %99 = vector.load %arg12[%c0_98, %c0_99, %c0_100] : memref<3x8x8xf32, #tpu.memory_space<vmem>>, vector<1x8x8xf32>
    %100 = vector.shape_cast %99 : vector<1x8x8xf32> to vector<8x8xf32>
    %cst_101 = arith.constant dense<0.000000e+00> : vector<8x32xf32>
    %101 = tpu.matmul %100, %98, %cst_101 {dimension_numbers = #tpu.dot_dimension_numbers<[1], [0], [0], [1], [0, 0, 1, 1], [], []>} : vector<8x8xf32>, vector<8x32xf32>, vector<8x32xf32> -> vector<8x32xf32>
    %c2_102 = arith.constant 2 : index
    %c0_103 = arith.constant 0 : index
    %c0_104 = arith.constant 0 : index
    %102 = vector.load %arg16[%c2_102, %c0_103, %c0_104] : memref<4x32x32xf32, #tpu.memory_space<vmem>>, vector<1x32x32xf32>
    %103 = vector.shape_cast %102 : vector<1x32x32xf32> to vector<32x32xf32>
    %cst_105 = arith.constant dense<0.000000e+00> : vector<8x32xf32>
    %104 = tpu.matmul %95, %103, %cst_105 {dimension_numbers = #tpu.dot_dimension_numbers<[1], [0], [0], [1], [0, 0, 1, 1], [], []>} : vector<8x32xf32>, vector<32x32xf32>, vector<8x32xf32> -> vector<8x32xf32>
    %c1_106 = arith.constant 1 : index
    %c0_107 = arith.constant 0 : index
    %c0_108 = arith.constant 0 : index
    %105 = vector.load %arg12[%c1_106, %c0_107, %c0_108] : memref<3x8x8xf32, #tpu.memory_space<vmem>>, vector<1x8x8xf32>
    %106 = vector.shape_cast %105 : vector<1x8x8xf32> to vector<8x8xf32>
    %cst_109 = arith.constant dense<0.000000e+00> : vector<8x32xf32>
    %107 = tpu.matmul %106, %104, %cst_109 {dimension_numbers = #tpu.dot_dimension_numbers<[1], [0], [0], [1], [0, 0, 1, 1], [], []>} : vector<8x8xf32>, vector<8x32xf32>, vector<8x32xf32> -> vector<8x32xf32>
    %108 = arith.addf %101, %107 : vector<8x32xf32>
    %c2_110 = arith.constant 2 : index
    %c0_111 = arith.constant 0 : index
    %c0_112 = arith.constant 0 : index
    %109 = vector.load %arg12[%c2_110, %c0_111, %c0_112] : memref<3x8x8xf32, #tpu.memory_space<vmem>>, vector<1x8x8xf32>
    %110 = vector.shape_cast %109 : vector<1x8x8xf32> to vector<8x8xf32>
    %cst_113 = arith.constant dense<0.000000e+00> : vector<8x32xf32>
    %111 = tpu.matmul %110, %95, %cst_113 {dimension_numbers = #tpu.dot_dimension_numbers<[1], [0], [0], [1], [0, 0, 1, 1], [], []>} : vector<8x8xf32>, vector<8x32xf32>, vector<8x32xf32> -> vector<8x32xf32>
    %112 = arith.addf %108, %111 : vector<8x32xf32>
    %c0_114 = arith.constant 0 : index
    %c0_115 = arith.constant 0 : index
    %113 = vector.load %arg13[%c0_114, %c0_115] : memref<8x1xf32, #tpu.memory_space<vmem>>, vector<8x1xf32>
    %114 = vector.broadcast %113 : vector<8x1xf32> to vector<8x32xf32>
    %115 = arith.addf %112, %114 : vector<8x32xf32>
    %cst_116 = arith.constant 0.000000e+00 : f32
    %116 = vector.broadcast %cst_116 : f32 to vector<8x32xf32>
    %117 = arith.maximumf %115, %116 : vector<8x32xf32>
    %c3_117 = arith.constant 3 : index
    %c0_118 = arith.constant 0 : index
    %c0_119 = arith.constant 0 : index
    %118 = vector.load %arg16[%c3_117, %c0_118, %c0_119] : memref<4x32x32xf32, #tpu.memory_space<vmem>>, vector<1x32x32xf32>
    %119 = vector.shape_cast %118 : vector<1x32x32xf32> to vector<32x32xf32>
    %cst_120 = arith.constant dense<0.000000e+00> : vector<8x32xf32>
    %120 = tpu.matmul %117, %119, %cst_120 {dimension_numbers = #tpu.dot_dimension_numbers<[1], [0], [0], [1], [0, 0, 1, 1], [], []>} : vector<8x32xf32>, vector<32x32xf32>, vector<8x32xf32> -> vector<8x32xf32>
    %c0_121 = arith.constant 0 : index
    %c0_122 = arith.constant 0 : index
    %c0_123 = arith.constant 0 : index
    %121 = vector.load %arg14[%c0_121, %c0_122, %c0_123] : memref<3x8x8xf32, #tpu.memory_space<vmem>>, vector<1x8x8xf32>
    %122 = vector.shape_cast %121 : vector<1x8x8xf32> to vector<8x8xf32>
    %cst_124 = arith.constant dense<0.000000e+00> : vector<8x32xf32>
    %123 = tpu.matmul %122, %120, %cst_124 {dimension_numbers = #tpu.dot_dimension_numbers<[1], [0], [0], [1], [0, 0, 1, 1], [], []>} : vector<8x8xf32>, vector<8x32xf32>, vector<8x32xf32> -> vector<8x32xf32>
    %c2_125 = arith.constant 2 : index
    %c0_126 = arith.constant 0 : index
    %c0_127 = arith.constant 0 : index
    %124 = vector.load %arg16[%c2_125, %c0_126, %c0_127] : memref<4x32x32xf32, #tpu.memory_space<vmem>>, vector<1x32x32xf32>
    %125 = vector.shape_cast %124 : vector<1x32x32xf32> to vector<32x32xf32>
    %cst_128 = arith.constant dense<0.000000e+00> : vector<8x32xf32>
    %126 = tpu.matmul %117, %125, %cst_128 {dimension_numbers = #tpu.dot_dimension_numbers<[1], [0], [0], [1], [0, 0, 1, 1], [], []>} : vector<8x32xf32>, vector<32x32xf32>, vector<8x32xf32> -> vector<8x32xf32>
    %c1_129 = arith.constant 1 : index
    %c0_130 = arith.constant 0 : index
    %c0_131 = arith.constant 0 : index
    %127 = vector.load %arg14[%c1_129, %c0_130, %c0_131] : memref<3x8x8xf32, #tpu.memory_space<vmem>>, vector<1x8x8xf32>
    %128 = vector.shape_cast %127 : vector<1x8x8xf32> to vector<8x8xf32>
    %cst_132 = arith.constant dense<0.000000e+00> : vector<8x32xf32>
    %129 = tpu.matmul %128, %126, %cst_132 {dimension_numbers = #tpu.dot_dimension_numbers<[1], [0], [0], [1], [0, 0, 1, 1], [], []>} : vector<8x8xf32>, vector<8x32xf32>, vector<8x32xf32> -> vector<8x32xf32>
    %130 = arith.addf %123, %129 : vector<8x32xf32>
    %c2_133 = arith.constant 2 : index
    %c0_134 = arith.constant 0 : index
    %c0_135 = arith.constant 0 : index
    %131 = vector.load %arg14[%c2_133, %c0_134, %c0_135] : memref<3x8x8xf32, #tpu.memory_space<vmem>>, vector<1x8x8xf32>
    %132 = vector.shape_cast %131 : vector<1x8x8xf32> to vector<8x8xf32>
    %cst_136 = arith.constant dense<0.000000e+00> : vector<8x32xf32>
    %133 = tpu.matmul %132, %117, %cst_136 {dimension_numbers = #tpu.dot_dimension_numbers<[1], [0], [0], [1], [0, 0, 1, 1], [], []>} : vector<8x8xf32>, vector<8x32xf32>, vector<8x32xf32> -> vector<8x32xf32>
    %134 = arith.addf %130, %133 : vector<8x32xf32>
    %c0_137 = arith.constant 0 : index
    %c0_138 = arith.constant 0 : index
    %135 = vector.load %arg15[%c0_137, %c0_138] : memref<8x1xf32, #tpu.memory_space<vmem>>, vector<8x1xf32>
    %136 = vector.broadcast %135 : vector<8x1xf32> to vector<8x32xf32>
    %137 = arith.addf %134, %136 : vector<8x32xf32>
    %138 = arith.addf %137, %95 : vector<8x32xf32>
    %c0_139 = arith.constant 0 : index
    %c0_140 = arith.constant 0 : index
    %c0_141 = arith.constant 0 : index
    %139 = vector.load %arg19[%c0_139, %c0_140, %c0_141] : memref<8x32x2xf32, #tpu.memory_space<vmem>>, vector<1x32x2xf32>
    %140 = vector.shape_cast %139 : vector<1x32x2xf32> to vector<32x2xf32>
    %cst_142 = arith.constant dense<0.000000e+00> : vector<8x2xf32>
    %141 = tpu.matmul %138, %140, %cst_142 {dimension_numbers = #tpu.dot_dimension_numbers<[1], [0], [0], [1], [0, 0, 1, 1], [], []>} : vector<8x32xf32>, vector<32x2xf32>, vector<8x2xf32> -> vector<8x2xf32>
    %c0_143 = arith.constant 0 : index
    %c0_144 = arith.constant 0 : index
    %c0_145 = arith.constant 0 : index
    %142 = vector.load %arg17[%c0_143, %c0_144, %c0_145] : memref<8x8x8xf32, #tpu.memory_space<vmem>>, vector<1x8x8xf32>
    %143 = vector.shape_cast %142 : vector<1x8x8xf32> to vector<8x8xf32>
    %cst_146 = arith.constant dense<0.000000e+00> : vector<8x2xf32>
    %144 = tpu.matmul %143, %141, %cst_146 {dimension_numbers = #tpu.dot_dimension_numbers<[1], [0], [0], [1], [0, 0, 1, 1], [], []>} : vector<8x8xf32>, vector<8x2xf32>, vector<8x2xf32> -> vector<8x2xf32>
    %c1_147 = arith.constant 1 : index
    %c0_148 = arith.constant 0 : index
    %c0_149 = arith.constant 0 : index
    %145 = vector.load %arg19[%c1_147, %c0_148, %c0_149] : memref<8x32x2xf32, #tpu.memory_space<vmem>>, vector<1x32x2xf32>
    %146 = vector.shape_cast %145 : vector<1x32x2xf32> to vector<32x2xf32>
    %cst_150 = arith.constant dense<0.000000e+00> : vector<8x2xf32>
    %147 = tpu.matmul %138, %146, %cst_150 {dimension_numbers = #tpu.dot_dimension_numbers<[1], [0], [0], [1], [0, 0, 1, 1], [], []>} : vector<8x32xf32>, vector<32x2xf32>, vector<8x2xf32> -> vector<8x2xf32>
    %c1_151 = arith.constant 1 : index
    %c0_152 = arith.constant 0 : index
    %c0_153 = arith.constant 0 : index
    %148 = vector.load %arg17[%c1_151, %c0_152, %c0_153] : memref<8x8x8xf32, #tpu.memory_space<vmem>>, vector<1x8x8xf32>
    %149 = vector.shape_cast %148 : vector<1x8x8xf32> to vector<8x8xf32>
    %cst_154 = arith.constant dense<0.000000e+00> : vector<8x2xf32>
    %150 = tpu.matmul %149, %147, %cst_154 {dimension_numbers = #tpu.dot_dimension_numbers<[1], [0], [0], [1], [0, 0, 1, 1], [], []>} : vector<8x8xf32>, vector<8x2xf32>, vector<8x2xf32> -> vector<8x2xf32>
    %151 = arith.addf %144, %150 : vector<8x2xf32>
    %c2_155 = arith.constant 2 : index
    %c0_156 = arith.constant 0 : index
    %c0_157 = arith.constant 0 : index
    %152 = vector.load %arg19[%c2_155, %c0_156, %c0_157] : memref<8x32x2xf32, #tpu.memory_space<vmem>>, vector<1x32x2xf32>
    %153 = vector.shape_cast %152 : vector<1x32x2xf32> to vector<32x2xf32>
    %cst_158 = arith.constant dense<0.000000e+00> : vector<8x2xf32>
    %154 = tpu.matmul %138, %153, %cst_158 {dimension_numbers = #tpu.dot_dimension_numbers<[1], [0], [0], [1], [0, 0, 1, 1], [], []>} : vector<8x32xf32>, vector<32x2xf32>, vector<8x2xf32> -> vector<8x2xf32>
    %c2_159 = arith.constant 2 : index
    %c0_160 = arith.constant 0 : index
    %c0_161 = arith.constant 0 : index
    %155 = vector.load %arg17[%c2_159, %c0_160, %c0_161] : memref<8x8x8xf32, #tpu.memory_space<vmem>>, vector<1x8x8xf32>
    %156 = vector.shape_cast %155 : vector<1x8x8xf32> to vector<8x8xf32>
    %cst_162 = arith.constant dense<0.000000e+00> : vector<8x2xf32>
    %157 = tpu.matmul %156, %154, %cst_162 {dimension_numbers = #tpu.dot_dimension_numbers<[1], [0], [0], [1], [0, 0, 1, 1], [], []>} : vector<8x8xf32>, vector<8x2xf32>, vector<8x2xf32> -> vector<8x2xf32>
    %158 = arith.addf %151, %157 : vector<8x2xf32>
    %c3_163 = arith.constant 3 : index
    %c0_164 = arith.constant 0 : index
    %c0_165 = arith.constant 0 : index
    %159 = vector.load %arg19[%c3_163, %c0_164, %c0_165] : memref<8x32x2xf32, #tpu.memory_space<vmem>>, vector<1x32x2xf32>
    %160 = vector.shape_cast %159 : vector<1x32x2xf32> to vector<32x2xf32>
    %cst_166 = arith.constant dense<0.000000e+00> : vector<8x2xf32>
    %161 = tpu.matmul %138, %160, %cst_166 {dimension_numbers = #tpu.dot_dimension_numbers<[1], [0], [0], [1], [0, 0, 1, 1], [], []>} : vector<8x32xf32>, vector<32x2xf32>, vector<8x2xf32> -> vector<8x2xf32>
    %c3_167 = arith.constant 3 : index
    %c0_168 = arith.constant 0 : index
    %c0_169 = arith.constant 0 : index
    %162 = vector.load %arg17[%c3_167, %c0_168, %c0_169] : memref<8x8x8xf32, #tpu.memory_space<vmem>>, vector<1x8x8xf32>
    %163 = vector.shape_cast %162 : vector<1x8x8xf32> to vector<8x8xf32>
    %cst_170 = arith.constant dense<0.000000e+00> : vector<8x2xf32>
    %164 = tpu.matmul %163, %161, %cst_170 {dimension_numbers = #tpu.dot_dimension_numbers<[1], [0], [0], [1], [0, 0, 1, 1], [], []>} : vector<8x8xf32>, vector<8x2xf32>, vector<8x2xf32> -> vector<8x2xf32>
    %165 = arith.addf %158, %164 : vector<8x2xf32>
    %c4 = arith.constant 4 : index
    %c0_171 = arith.constant 0 : index
    %c0_172 = arith.constant 0 : index
    %166 = vector.load %arg19[%c4, %c0_171, %c0_172] : memref<8x32x2xf32, #tpu.memory_space<vmem>>, vector<1x32x2xf32>
    %167 = vector.shape_cast %166 : vector<1x32x2xf32> to vector<32x2xf32>
    %cst_173 = arith.constant dense<0.000000e+00> : vector<8x2xf32>
    %168 = tpu.matmul %138, %167, %cst_173 {dimension_numbers = #tpu.dot_dimension_numbers<[1], [0], [0], [1], [0, 0, 1, 1], [], []>} : vector<8x32xf32>, vector<32x2xf32>, vector<8x2xf32> -> vector<8x2xf32>
    %c4_174 = arith.constant 4 : index
    %c0_175 = arith.constant 0 : index
    %c0_176 = arith.constant 0 : index
    %169 = vector.load %arg17[%c4_174, %c0_175, %c0_176] : memref<8x8x8xf32, #tpu.memory_space<vmem>>, vector<1x8x8xf32>
    %170 = vector.shape_cast %169 : vector<1x8x8xf32> to vector<8x8xf32>
    %cst_177 = arith.constant dense<0.000000e+00> : vector<8x2xf32>
    %171 = tpu.matmul %170, %168, %cst_177 {dimension_numbers = #tpu.dot_dimension_numbers<[1], [0], [0], [1], [0, 0, 1, 1], [], []>} : vector<8x8xf32>, vector<8x2xf32>, vector<8x2xf32> -> vector<8x2xf32>
    %172 = arith.addf %165, %171 : vector<8x2xf32>
    %c5 = arith.constant 5 : index
    %c0_178 = arith.constant 0 : index
    %c0_179 = arith.constant 0 : index
    %173 = vector.load %arg19[%c5, %c0_178, %c0_179] : memref<8x32x2xf32, #tpu.memory_space<vmem>>, vector<1x32x2xf32>
    %174 = vector.shape_cast %173 : vector<1x32x2xf32> to vector<32x2xf32>
    %cst_180 = arith.constant dense<0.000000e+00> : vector<8x2xf32>
    %175 = tpu.matmul %138, %174, %cst_180 {dimension_numbers = #tpu.dot_dimension_numbers<[1], [0], [0], [1], [0, 0, 1, 1], [], []>} : vector<8x32xf32>, vector<32x2xf32>, vector<8x2xf32> -> vector<8x2xf32>
    %c5_181 = arith.constant 5 : index
    %c0_182 = arith.constant 0 : index
    %c0_183 = arith.constant 0 : index
    %176 = vector.load %arg17[%c5_181, %c0_182, %c0_183] : memref<8x8x8xf32, #tpu.memory_space<vmem>>, vector<1x8x8xf32>
    %177 = vector.shape_cast %176 : vector<1x8x8xf32> to vector<8x8xf32>
    %cst_184 = arith.constant dense<0.000000e+00> : vector<8x2xf32>
    %178 = tpu.matmul %177, %175, %cst_184 {dimension_numbers = #tpu.dot_dimension_numbers<[1], [0], [0], [1], [0, 0, 1, 1], [], []>} : vector<8x8xf32>, vector<8x2xf32>, vector<8x2xf32> -> vector<8x2xf32>
    %179 = arith.addf %172, %178 : vector<8x2xf32>
    %c6 = arith.constant 6 : index
    %c0_185 = arith.constant 0 : index
    %c0_186 = arith.constant 0 : index
    %180 = vector.load %arg19[%c6, %c0_185, %c0_186] : memref<8x32x2xf32, #tpu.memory_space<vmem>>, vector<1x32x2xf32>
    %181 = vector.shape_cast %180 : vector<1x32x2xf32> to vector<32x2xf32>
    %cst_187 = arith.constant dense<0.000000e+00> : vector<8x2xf32>
    %182 = tpu.matmul %138, %181, %cst_187 {dimension_numbers = #tpu.dot_dimension_numbers<[1], [0], [0], [1], [0, 0, 1, 1], [], []>} : vector<8x32xf32>, vector<32x2xf32>, vector<8x2xf32> -> vector<8x2xf32>
    %c6_188 = arith.constant 6 : index
    %c0_189 = arith.constant 0 : index
    %c0_190 = arith.constant 0 : index
    %183 = vector.load %arg17[%c6_188, %c0_189, %c0_190] : memref<8x8x8xf32, #tpu.memory_space<vmem>>, vector<1x8x8xf32>
    %184 = vector.shape_cast %183 : vector<1x8x8xf32> to vector<8x8xf32>
    %cst_191 = arith.constant dense<0.000000e+00> : vector<8x2xf32>
    %185 = tpu.matmul %184, %182, %cst_191 {dimension_numbers = #tpu.dot_dimension_numbers<[1], [0], [0], [1], [0, 0, 1, 1], [], []>} : vector<8x8xf32>, vector<8x2xf32>, vector<8x2xf32> -> vector<8x2xf32>
    %186 = arith.addf %179, %185 : vector<8x2xf32>
    %c7 = arith.constant 7 : index
    %c0_192 = arith.constant 0 : index
    %c0_193 = arith.constant 0 : index
    %187 = vector.load %arg19[%c7, %c0_192, %c0_193] : memref<8x32x2xf32, #tpu.memory_space<vmem>>, vector<1x32x2xf32>
    %188 = vector.shape_cast %187 : vector<1x32x2xf32> to vector<32x2xf32>
    %cst_194 = arith.constant dense<0.000000e+00> : vector<8x2xf32>
    %189 = tpu.matmul %138, %188, %cst_194 {dimension_numbers = #tpu.dot_dimension_numbers<[1], [0], [0], [1], [0, 0, 1, 1], [], []>} : vector<8x32xf32>, vector<32x2xf32>, vector<8x2xf32> -> vector<8x2xf32>
    %c7_195 = arith.constant 7 : index
    %c0_196 = arith.constant 0 : index
    %c0_197 = arith.constant 0 : index
    %190 = vector.load %arg17[%c7_195, %c0_196, %c0_197] : memref<8x8x8xf32, #tpu.memory_space<vmem>>, vector<1x8x8xf32>
    %191 = vector.shape_cast %190 : vector<1x8x8xf32> to vector<8x8xf32>
    %cst_198 = arith.constant dense<0.000000e+00> : vector<8x2xf32>
    %192 = tpu.matmul %191, %189, %cst_198 {dimension_numbers = #tpu.dot_dimension_numbers<[1], [0], [0], [1], [0, 0, 1, 1], [], []>} : vector<8x8xf32>, vector<8x2xf32>, vector<8x2xf32> -> vector<8x2xf32>
    %193 = arith.addf %186, %192 : vector<8x2xf32>
    %c0_199 = arith.constant 0 : index
    %c0_200 = arith.constant 0 : index
    %194 = vector.load %arg18[%c0_199, %c0_200] : memref<8x1xf32, #tpu.memory_space<vmem>>, vector<8x1xf32>
    %195 = vector.broadcast %194 : vector<8x1xf32> to vector<8x2xf32>
    %196 = arith.addf %193, %195 : vector<8x2xf32>
    %c0_201 = arith.constant 0 : index
    %c0_202 = arith.constant 0 : index
    %197 = vector.load %arg20[%c0_201, %c0_202] : memref<8x2xf32, #tpu.memory_space<vmem>>, vector<8x2xf32>
    tpu.vector_store %arg20[%c0_201, %c0_202], %196 {strides = array<i32>} : memref<8x2xf32, #tpu.memory_space<vmem>>, vector<8x2xf32>,
    return
  }
  func.func @transform_0(%arg0: i32) -> (i32, i32) {
    %c0_i32 = arith.constant 0 : i32
    %c0_i32_0 = arith.constant 0 : i32
    %c0_i32_1 = arith.constant 0 : i32
    return %c0_i32, %c0_i32_0 : i32, i32
  }
  func.func @transform_1(%arg0: i32) -> (i32, i32, i32) {
    %c0_i32 = arith.constant 0 : i32
    %c0_i32_0 = arith.constant 0 : i32
    %c0_i32_1 = arith.constant 0 : i32
    %c0_i32_2 = arith.constant 0 : i32
    return %c0_i32, %c0_i32_0, %c0_i32_1 : i32, i32, i32
  }
  func.func @transform_2(%arg0: i32) -> (i32, i32) {
    %c0_i32 = arith.constant 0 : i32
    %c0_i32_0 = arith.constant 0 : i32
    %c0_i32_1 = arith.constant 0 : i32
    return %c0_i32, %c0_i32_0 : i32, i32
  }
  func.func @transform_3(%arg0: i32) -> (i32, i32, i32) {
    %c0_i32 = arith.constant 0 : i32
    %c0_i32_0 = arith.constant 0 : i32
    %c0_i32_1 = arith.constant 0 : i32
    %c0_i32_2 = arith.constant 0 : i32
    return %c0_i32, %c0_i32_0, %c0_i32_1 : i32, i32, i32
  }
  func.func @transform_4(%arg0: i32) -> (i32, i32) {
    %c0_i32 = arith.constant 0 : i32
    %c0_i32_0 = arith.constant 0 : i32
    %c0_i32_1 = arith.constant 0 : i32
    return %c0_i32, %c0_i32_0 : i32, i32
  }
  func.func @transform_5(%arg0: i32) -> (i32, i32) {
    %c0_i32 = arith.constant 0 : i32
    %c0_i32_0 = arith.constant 0 : i32
    %c0_i32_1 = arith.constant 0 : i32
    return %c0_i32, %c0_i32_0 : i32, i32
  }
  func.func @transform_6(%arg0: i32) -> (i32, i32) {
    %c0_i32 = arith.constant 0 : i32
    %c0_i32_0 = arith.constant 0 : i32
    %c0_i32_1 = arith.constant 0 : i32
    return %c0_i32, %c0_i32_0 : i32, i32
  }
  func.func @transform_7(%arg0: i32) -> (i32, i32, i32) {
    %c0_i32 = arith.constant 0 : i32
    %c0_i32_0 = arith.constant 0 : i32
    %c0_i32_1 = arith.constant 0 : i32
    %c0_i32_2 = arith.constant 0 : i32
    return %c0_i32, %c0_i32_0, %c0_i32_1 : i32, i32, i32
  }
  func.func @transform_8(%arg0: i32) -> (i32, i32) {
    %c0_i32 = arith.constant 0 : i32
    %c0_i32_0 = arith.constant 0 : i32
    %c0_i32_1 = arith.constant 0 : i32
    return %c0_i32, %c0_i32_0 : i32, i32
  }
  func.func @transform_9(%arg0: i32) -> (i32, i32, i32) {
    %c0_i32 = arith.constant 0 : i32
    %c0_i32_0 = arith.constant 0 : i32
    %c0_i32_1 = arith.constant 0 : i32
    %c0_i32_2 = arith.constant 0 : i32
    return %c0_i32, %c0_i32_0, %c0_i32_1 : i32, i32, i32
  }
  func.func @transform_10(%arg0: i32) -> (i32, i32) {
    %c0_i32 = arith.constant 0 : i32
    %c0_i32_0 = arith.constant 0 : i32
    %c0_i32_1 = arith.constant 0 : i32
    return %c0_i32, %c0_i32_0 : i32, i32
  }
  func.func @transform_11(%arg0: i32) -> (i32, i32, i32) {
    %c0_i32 = arith.constant 0 : i32
    %c0_i32_0 = arith.constant 0 : i32
    %c0_i32_1 = arith.constant 0 : i32
    %c0_i32_2 = arith.constant 0 : i32
    return %c0_i32, %c0_i32_0, %c0_i32_1 : i32, i32, i32
  }
  func.func @transform_12(%arg0: i32) -> (i32, i32) {
    %c0_i32 = arith.constant 0 : i32
    %c0_i32_0 = arith.constant 0 : i32
    %c0_i32_1 = arith.constant 0 : i32
    return %c0_i32, %c0_i32_0 : i32, i32
  }
  func.func @transform_13(%arg0: i32) -> (i32, i32, i32) {
    %c0_i32 = arith.constant 0 : i32
    %c0_i32_0 = arith.constant 0 : i32
    %c0_i32_1 = arith.constant 0 : i32
    %c0_i32_2 = arith.constant 0 : i32
    return %c0_i32, %c0_i32_0, %c0_i32_1 : i32, i32, i32
  }
  func.func @transform_14(%arg0: i32) -> (i32, i32) {
    %c0_i32 = arith.constant 0 : i32
    %c0_i32_0 = arith.constant 0 : i32
    %c0_i32_1 = arith.constant 0 : i32
    return %c0_i32, %c0_i32_0 : i32, i32
  }
  func.func @transform_15(%arg0: i32) -> (i32, i32, i32) {
    %c0_i32 = arith.constant 0 : i32
    %c0_i32_0 = arith.constant 0 : i32
    %c0_i32_1 = arith.constant 0 : i32
    %c0_i32_2 = arith.constant 0 : i32
    return %c0_i32, %c0_i32_0, %c0_i32_1 : i32, i32, i32
  }
  func.func @transform_16(%arg0: i32) -> (i32, i32, i32) {
    %c0_i32 = arith.constant 0 : i32
    %c0_i32_0 = arith.constant 0 : i32
    %c0_i32_1 = arith.constant 0 : i32
    %c0_i32_2 = arith.constant 0 : i32
    return %c0_i32, %c0_i32_0, %c0_i32_1 : i32, i32, i32
  }
  func.func @transform_17(%arg0: i32) -> (i32, i32) {
    %c0_i32 = arith.constant 0 : i32
    %c0_i32_0 = arith.constant 0 : i32
    %c0_i32_1 = arith.constant 0 : i32
    return %c0_i32, %c0_i32_0 : i32, i32
  }
  func.func @transform_18(%arg0: i32) -> (i32, i32, i32) {
    %c0_i32 = arith.constant 0 : i32
    %c0_i32_0 = arith.constant 0 : i32
    %c0_i32_1 = arith.constant 0 : i32
    %c0_i32_2 = arith.constant 0 : i32
    return %c0_i32, %c0_i32_0, %c0_i32_1 : i32, i32, i32
  }
  func.func @transform_19(%arg0: i32) -> (i32, i32) {
    %c0_i32 = arith.constant 0 : i32
    %c0_i32_0 = arith.constant 0 : i32
    %c0_i32_1 = arith.constant 0 : i32
    return %c0_i32, %c0_i32_0 : i32, i32
  }
}

</mosaic_0001>

<bundles_post_ra>
// kernel: _lambda_.1
= control target key start
LH: loop header
LB: loop body
LE: loop exit
PB: predicated region body
PF: predicated region fallthrough
CT: control target
= control target key end

     0   :  { %s5142_s0 = inlined_call_operand.vmem [shape: f32[4,32], index: 0, kind: input, shape index: {}]   ;;  %s5143_s1 = inlined_call_operand.vmem [shape: f32[3,8,4], index: 1, kind: input, shape index: {}]   ;;  %s5144_s2 = inlined_call_operand.vmem [shape: f32[8,1], index: 2, kind: input, shape index: {}]   ;;  %s5145_s3 = inlined_call_operand.vmem [shape: f32[3,8,8], index: 3, kind: input, shape index: {}]   ;;  %s5146_s4 = inlined_call_operand.vmem [shape: f32[8,1], index: 4, kind: input, shape index: {}]   ;;  %s5147_s5 = inlined_call_operand.vmem [shape: f32[8,4], index: 5, kind: input, shape index: {}]   ;;  %s5148_s6 = inlined_call_operand.vmem [shape: f32[8,1], index: 6, kind: input, shape index: {}]   ;;  %s5149_s7 = inlined_call_operand.hbm [shape: f32[3,8,8], index: 7, kind: input, shape index: {}]   ;;  %s5150_s8 = inlined_call_operand.vmem [shape: f32[8,1], index: 8, kind: input, shape index: {}]   ;;  %s5151_s9 = inlined_call_operand.hbm [shape: f32[3,8,8], index: 9, kind: input, shape index: {}]   ;;  %s5152_s10 = inlined_call_operand.vmem [shape: f32[8,1], index: 10, kind: input, shape index: {}]   ;;  %s5153_s11 = inlined_call_operand.hbm [shape: f32[3,8,8], index: 11, kind: input, shape index: {}]   ;;  %s5154_s12 = inlined_call_operand.vmem [shape: f32[8,1], index: 12, kind: input, shape index: {}]   ;;  %s5155_s13 = inlined_call_operand.hbm [shape: f32[3,8,8], index: 13, kind: input, shape index: {}]   ;;  %s5156_s14 = inlined_call_operand.vmem [shape: f32[8,1], index: 14, kind: input, shape index: {}]   ;;  %s5157_s15 = inlined_call_operand.vmem [shape: f32[4,32,32], index: 15, kind: input, shape index: {}]   ;;  %s5158_s16 = inlined_call_operand.vmem [shape: f32[8,8,8], index: 16, kind: input, shape index: {}]   ;;  %s5159_s17 = inlined_call_operand.vmem [shape: f32[8,1], index: 17, kind: input, shape index: {}]   ;;  %s5160_s18 = inlined_call_operand.hbm [shape: f32[8,32,2], index: 18, kind: input, shape index: {}]   ;;  %s5161_s19 = inlined_call_operand.vmem [shape: f32[8,2], index: 19, kind: output, shape index: {}]  }
   0x1   :  { %5164 = sst [smem:[#allocation13_spill]] %s5142_s0 }
   0x2   :  { %5165 = sst [smem:[#allocation14_spill]] %s5143_s1 }
   0x3   :  { %5166 = sst [smem:[#allocation15_spill]] %s5144_s2 }
   0x4   :  { %5167 = sst [smem:[#allocation16_spill]] %s5145_s3 }
   0x5   :  { %24 = vsyncpa [#allocation3], 0 }
   0x6   :  { %25 = vsyncpa [#allocation5], 0 }
   0x7   :  { %26 = vsyncpa [#allocation8], 0  ;;  %s4555_s0 = smov [#allocation4]   ;;  %s4556_s20 = smov [#allocation7]  }
   0x8   :  { %s60_s30 = sshll.u32 %s4555_s0, 4  ;;  %s88_s21 = sshll.u32 %s4556_s20, 4  ;;  %s61_s30 = int_to_ptr.vmem [resolvable:$true] %s60_s30  ;;  %s4666_s21 = int_to_ptr.vmem [resolvable:$true] %s88_s21 }
   0x9   :  { %s4439_s2 = scalar_lea.hbm %s5151_s9, 384 }
   0xa   :  { %p4440_p0 = scmp.ne.s32.totalorder %s5151_s9, %s4439_s2  ;;  %p4443_p1 = scmp.lt.u32.totalorder %s4439_s2, %s5151_s9 }
   0xc   :  { %p4445_p2 = pnand %p4443_p1, %p4440_p0 }
   0xe   :  { %4448 = shalt.err (!%p4445_p2)
}
   0xf   :  { %s4449_s26 = scalar_lea.vmem %s61_s30, 384  ;;  %p4454_p4 = scmp.lt.s32.totalorder %s61_s30, %s61_s30 }
  0x10   :  { %p4450_p3 = scmp.ne.s32.totalorder %s61_s30, %s4449_s26  ;;  %p4455_p5 = scmp.lt.s32.totalorder %s4449_s26, %s4449_s26 }
  0x12   :  { %p4456_p6 = por %p4455_p5, %p4454_p4 }
  0x14   :  { %p4457_p7 = pnand %p4456_p6, %p4450_p3 }
  0x16   :  { %4460 = shalt.err (!%p4457_p7)
}
  0x17   :  { %s4557_s27 = smov 128   ;;  %s4558_s28 = smov 8  }
  0x18   :  { %66 = dma.hbm_to_vmem [thread:$0]  %s5151_s9, 384, %s61_s30, [#allocation5], %s4557_s27, %s4557_s27, %s4558_s28  }
  0x19   :  { %s4461_s22 = scalar_lea.hbm %s5155_s13, 384 }
  0x1a   :  { %p4462_p8 = scmp.ne.s32.totalorder %s5155_s13, %s4461_s22  ;;  %p4465_p9 = scmp.lt.u32.totalorder %s4461_s22, %s5155_s13 }
  0x1c   :  { %p4467_p10 = pnand %p4465_p9, %p4462_p8 }
  0x1e   :  { %4470 = shalt.err (!%p4467_p10)
}
  0x1f   :  { %s4471_s3 = scalar_lea.vmem %s4666_s21, 384  ;;  %p4476_p12 = scmp.lt.s32.totalorder %s4666_s21, %s4666_s21 }
  0x20   :  { %p4472_p11 = scmp.ne.s32.totalorder %s4666_s21, %s4471_s3  ;;  %p4477_p13 = scmp.lt.s32.totalorder %s4471_s3, %s4471_s3 }
  0x22   :  { %p4478_p0 = por %p4477_p13, %p4476_p12 }
  0x24   :  { %p4479_p1 = pnand %p4478_p0, %p4472_p11 }
  0x26   :  { %4482 = shalt.err (!%p4479_p1)
}
  0x27   :  { %94 = dma.hbm_to_vmem [thread:$0]  %s5155_s13, 384, %s4666_s21, [#allocation8], %s4557_s27, %s4557_s27, %s4558_s28  }
  0x28   :  { %s4559_s26 = smov [#allocation2]   ;;  %s4560_s0 = smov [#allocation6]  }
  0x29   :  { %s46_s29 = sshll.u32 %s4559_s26, 4  ;;  %s74_s20 = sshll.u32 %s4560_s0, 4  ;;  %s47_s29 = int_to_ptr.vmem [resolvable:$true] %s46_s29  ;;  %s4703_s20 = int_to_ptr.vmem [resolvable:$true] %s74_s20 }
  0x2a   :  { %s4483_s2 = scalar_lea.hbm %s5149_s7, 384 }
  0x2b   :  { %p4484_p2 = scmp.ne.s32.totalorder %s5149_s7, %s4483_s2  ;;  %p4487_p3 = scmp.lt.u32.totalorder %s4483_s2, %s5149_s7 }
  0x2d   :  { %p4489_p4 = pnand %p4487_p3, %p4484_p2 }
  0x2f   :  { %4492 = shalt.err (!%p4489_p4)
}
  0x30   :  { %s4493_s13 = scalar_lea.vmem %s47_s29, 384  ;;  %p4498_p6 = scmp.lt.s32.totalorder %s47_s29, %s47_s29 }
  0x31   :  { %p4494_p5 = scmp.ne.s32.totalorder %s47_s29, %s4493_s13  ;;  %p4499_p7 = scmp.lt.s32.totalorder %s4493_s13, %s4493_s13 }
  0x33   :  { %p4500_p8 = por %p4499_p7, %p4498_p6 }
  0x35   :  { %p4501_p9 = pnand %p4500_p8, %p4494_p5 }
  0x37   :  { %4504 = shalt.err (!%p4501_p9)
}
  0x38   :  { %52 = dma.hbm_to_vmem [thread:$0]  %s5149_s7, 384, %s47_s29, [#allocation3], %s4557_s27, %s4557_s27, %s4558_s28  }
  0x39   :  { %s4505_s0 = scalar_lea.hbm %s5153_s11, 384 }
  0x3a   :  { %p4506_p10 = scmp.ne.s32.totalorder %s5153_s11, %s4505_s0  ;;  %p4509_p11 = scmp.lt.u32.totalorder %s4505_s0, %s5153_s11 }
  0x3c   :  { %p4511_p12 = pnand %p4509_p11, %p4506_p10 }
  0x3e   :  { %4514 = shalt.err (!%p4511_p12)
}
  0x3f   :  { %s4515_s24 = scalar_lea.vmem %s4703_s20, 384  ;;  %p4520_p0 = scmp.lt.s32.totalorder %s4703_s20, %s4703_s20 }
  0x40   :  { %p4516_p13 = scmp.ne.s32.totalorder %s4703_s20, %s4515_s24  ;;  %p4521_p1 = scmp.lt.s32.totalorder %s4515_s24, %s4515_s24 }
  0x42   :  { %p4522_p2 = por %p4521_p1, %p4520_p0 }
  0x44   :  { %p4523_p3 = pnand %p4522_p2, %p4516_p13 }
  0x46   :  { %4526 = shalt.err (!%p4523_p3)
}
  0x47   :  { %80 = dma.hbm_to_vmem [thread:$0]  %s5153_s11, 384, %s4703_s20, [#allocation5], %s4557_s27, %s4557_s27, %s4558_s28  }
  0x48   :  { %s4561_s25 = smov [#allocation9]   ;;  %s4527_s9 = scalar_lea.hbm %s5160_s18, 4096 }
  0x49   :  { %s108_s3 = sshll.u32 %s4561_s25, 4  ;;  %p4528_p4 = scmp.ne.s32.totalorder %s5160_s18, %s4527_s9  ;;  %s109_s3 = int_to_ptr.vmem [resolvable:$true] %s108_s3 }
  0x4a   :  { %p4531_p5 = scmp.lt.u32.totalorder %s4527_s9, %s5160_s18 }
  0x4c   :  { %p4533_p6 = pnand %p4531_p5, %p4528_p4 }
  0x4e   :  { %4536 = shalt.err (!%p4533_p6)
}
  0x4f   :  { %s4537_s22 = scalar_lea.vmem %s109_s3, 4096  ;;  %p4542_p8 = scmp.lt.s32.totalorder %s109_s3, %s109_s3 }
  0x50   :  { %p4538_p7 = scmp.ne.s32.totalorder %s109_s3, %s4537_s22  ;;  %p4543_p9 = scmp.lt.s32.totalorder %s4537_s22, %s4537_s22 }
  0x52   :  { %p4544_p10 = por %p4543_p9, %p4542_p8 }
  0x54   :  { %p4545_p11 = pnand %p4544_p10, %p4538_p7 }
  0x56   :  { %4548 = shalt.err (!%p4545_p11)
}
  0x57   :  { %114 = dma.hbm_to_vmem [thread:$0]  %s5160_s18, 4096, %s109_s3, [#allocation8], %s4557_s27, %s4557_s27, %s4558_s28  }
  0x58   :  { %4549 = dma.done.wait [#allocation3], 384  }
  0x59   :  { %4550 = vsyncadd [#allocation3], 4294966912 }
  0x5a   :  { %4551 = dma.done.wait [#allocation5], 768  }
  0x5b   :  { %4552 = vsyncadd [#allocation5], 4294966528 }
  0x5c   :  { %4553 = dma.done.wait [#allocation8], 4480  }
  0x5d   :  { %4554 = vsyncadd [#allocation8], 4294962816  ;;  %v4562_v0 = vmov 0.0|0.0   ;;  %vm4563_vm0 = vmmov 0   ;;  %v4564_v1 = vmov 0.0   ;;  %v131_v2 = vld [vmem:[%s5157_s15] sm:$0xff] }
  0x5e   :  { %4306 = vmatprep.subr.bf16.mxu0 %v4562_v0  ;;  %4312 = vmatprep.subr.bf16.mxu1 %v4562_v0  ;;  %v132_v3 = vld [vmem:[%s5157_s15 + $0x8] sm:$0xff]  ;;  %v3724_v4 = vld [vmem:[%s5157_s15 + $0x20] sm:$0xff]  ;;  %v133_v7 = vld [vmem:[%s5157_s15 + $0x10] sm:$0xff]  ;;  %s5168_s11 = sld [smem:[#allocation13_spill]]  ;;  %vm135_vm1 = vcmask 261120   ;;  %s5169_s27 = sld [smem:[#allocation15_spill]] }
  0x5f   :  { %3959 = vmatprep.mubr.msk.f32.mxu0 %vm4563_vm0, %v4564_v1  ;;  %3970 = vmatprep.mubr.msk.f32.mxu1 %vm4563_vm0, %v4564_v1  ;;  %v4770_v5 = vpack.c.bf16 %v132_v3, %v131_v2  ;;  %v3725_v6 = vld [vmem:[%s5157_s15 + $0x28] sm:$0xff]  ;;  %v134_v8 = vld [vmem:[%s5157_s15 + $0x18] sm:$0xff]  ;;  %v3726_v10 = vld [vmem:[%s5157_s15 + $0x30] sm:$0xff]  ;;  %v4565_v16 = vmov 0   ;;  %vm291_vm2 = vcmask 1043456   ;;  %vm287_vm3 = vcmask 31744  }
  0x60   :  { %v4313_v9 = vpack.c.bf16 %v3725_v6, %v3724_v4  ;;  %v3727_v11 = vld [vmem:[%s5157_s15 + $0x38] sm:$0xff]  ;;  %v4788_v12 = vpack.c.bf16 %v134_v8, %v133_v7  ;;  %4437 = vset.pattern.permute.xlu0 %v4565_v16  ;;  %4438 = vset.pattern.permute.xlu1 %v4565_v16  ;;  %v896_v17 = vld [vmem:[%s5146_s4] sm:$0xff]  ;;  %s5170_s13 = sld [smem:[#allocation14_spill]]  ;;  %s5171_s28 = sld [smem:[#allocation16_spill]]  ;;  %vm673_vm4 = vcmask 64512   ;;  %v3747_v51 = vld [vmem:[%s5157_s15 + $0x48] sm:$0xff] }
  0x61   :  { %4308 = vmatpush3.bf16.msra.mxu0 %v4770_v5  ;;  %v4316_v13 = vpack.c.bf16 %v3727_v11, %v3726_v10  ;;  %v1734_v18 = vld [vmem:[%s5152_s10] sm:$0xff]  ;;  %v3748_v53 = vld [vmem:[%s5157_s15 + $0x50] sm:$0xff]  ;;  %v3749_v54 = vld [vmem:[%s5157_s15 + $0x58] sm:$0xff]  ;;  %vm3714_vm5 = vcmask 15360  }
  0x62   :  { %4314 = vmatpush3.bf16.msra.mxu1 %v4313_v9  ;;  %4309 = vmatprep.subr.bf16.mxu0 %v4562_v0  ;;  %v2492_v19 = vld [vmem:[%s5156_s14] sm:$0xff]  ;;  %v4919_v55 = vpack.c.bf16 %v3749_v54, %v3748_v53  ;;  %v1135_v11 = vld [vmem:[#allocation2 + $0x8] sm:$0xff]  ;;  %v1893_v54 = vld [vmem:[#allocation6 + $0x8] sm:$0xff] }
  0x63   :  { %4315 = vmatprep.subr.bf16.mxu1 %v4562_v0  ;;  %v905_v38 = vld [vmem:[%s5148_s6] sm:$0xff] }
  0x64   :  { %v4796_v14 = vld [vmem:[%s5168_s11] sm:$0xf]  ;;  %908 = vperm.xlu1 %4438, %v905_v38   ;;  %v3762_v38 = vld [vmem:[%s5157_s15 + $0x70] sm:$0xff] }
  0x65   :  { %4311 = vmatpush3.bf16.msra.mxu0 %v4788_v12  ;;  %v519_v15 = vld [vmem:[%s5169_s27] sm:$0xff] }
  0x66   :  { %4317 = vmatpush3.bf16.msra.mxu1 %v4316_v13  ;;  %3973 = vmatprep.subr.mxu0 %v4564_v1  ;;  %v209_v20 = vld [vmem:[%s5170_s13] sm:$0xff]  ;;  %v3729_v22 = vld [vmem:[%s5170_s13 + $0x8] sm:$0xff]  ;;  %v3734_v26 = vld [vmem:[%s5170_s13 + $0x10] sm:$0xff] }
  0x67   :  { %3978 = vmatprep.subr.mxu1 %v4564_v1  ;;  %522 = vperm.xlu0 %4437, %v519_v15   ;;  %v1358_v39 = vld [vmem:[%s5150_s8] sm:$0xff]  ;;  %v3739_v42 = vld [vmem:[%s5171_s28 + $0x8] sm:$0xff]  ;;  %v3742_v48 = vld [vmem:[%s5171_s28 + $0x10] sm:$0xff] }
  0x68   :  { %3960 = vmatmul.mubr.msk.f32.vlgmr.msra.gmra.mrb[0].mxu0 %vm135_vm1, %v4796_v14  ;;  %1361 = vperm.xlu1 %4438, %v1358_v39   ;;  %v2116_v40 = vld [vmem:[%s5154_s12] sm:$0xff]  ;;  %v3763_v39 = vld [vmem:[%s5157_s15 + $0x78] sm:$0xff] }
  0x69   :  { %3971 = vmatmul.mubr.msk.f32.vlgmr.msra.gmra.mrb[0].mxu1 %vm135_vm1, %v4796_v14  ;;  %3975 = vmatprep.mubr.msk.f32.mxu0 %vm4563_vm0, %v4564_v1  ;;  %v3707_v41 = vld [vmem:[%s5159_s17] sm:$0xff] }
  0x6a   :  { %3980 = vmatprep.mubr.msk.f32.mxu1 %vm4563_vm0, %v4564_v1  ;;  %v600_v43 = vld [vmem:[%s5171_s28] sm:$0xff] }
  0x6b   :  { %899 = vperm.xlu0 %4437, %v896_v17   ;;  %v904_v49 = vld [vmem:[%s5147_s5] sm:$0xff] }
  0x6c   :  { %2119 = vperm.xlu1 %4438, %v2116_v40   ;;  %v3746_v50 = vld [vmem:[%s5157_s15 + $0x40] sm:$0xff]  ;;  %v4358_v40 = vpack.c.bf16 %v3763_v39, %v3762_v38 }
  0x6d   :  { %v4909_v52 = vpack.c.bf16 %v3747_v51, %v3746_v50  ;;  %v2802_v39 = vld [vmem:[#allocation9 + $0x40] sm:$0xff] }
  0x6f   :  { %1737 = vperm.xlu0 %4437, %v1734_v18   ;;  %v1283_v18 = vld [vmem:[#allocation2 + $0x10] sm:$0xff] }
  0x70   :  { %3710 = vperm.xlu1 %4438, %v3707_v41  }
  0x73   :  { %2495 = vperm.xlu0 %4437, %v2492_v19  }
  0xe3   :  { %v909_v6 = vpop.permute.xlu1 %908 }
  0xe6   :  { %v523_v35 = vpop.permute.xlu0 %522 }
  0xea   :  { %v900_v4 = vpop.permute.xlu0 %899 }
 0x13b   :  { %v205_v21 = vpop.f32.mrb[0].mxu0 }
 0x13c   :  { %v281_v23 = vpop.f32.mrb[0].mxu1  ;;  %3979 = vmatpush3.msk.msra.mxu1 %vm291_vm2, %v205_v21  ;;  %v3961_v24 = vpop.f32.mrb[1].mxu0 }
 0x13d   :  { %v3972_v25 = vpop.f32.mrb[1].mxu1  ;;  %3974 = vmatpush3.msk.msra.mxu0 %vm291_vm2, %v281_v23  ;;  %3981 = vmatmul.mubr.msk.f32.vlgmr.msra.gmra.mrb[2].mxu1 %vm287_vm3, %v209_v20 }
 0x13e   :  { %3976 = vmatmul.mubr.msk.f32.vlgmr.msra.gmra.mrb[2].mxu0 %vm287_vm3, %v3729_v22  ;;  %3983 = vmatprep.subr.mxu0 %v4564_v1 }
 0x13f   :  { %3984 = vmatpush3.msk.msra.mxu0 %vm291_vm2, %v4796_v14  ;;  %3985 = vmatprep.mubr.msk.f32.mxu0 %vm4563_vm0, %v4564_v1 }
 0x140   :  { %4318 = vmatprep.subr.bf16.mxu1 %v4562_v0  ;;  %4324 = vmatprep.subr.bf16.mxu0 %v4562_v0 }
 0x141   :  { %4320 = vmatpush3.bf16.msra.mxu1 %v4770_v5  ;;  %3996 = vmatprep.mubr.msk.f32.mxu1 %vm4563_vm0, %v4564_v1 }
 0x142   :  { %3986 = vmatmul.mubr.msk.f32.vlgmr.msra.gmra.mrb[4].mxu0 %vm287_vm3, %v3734_v26  ;;  %4321 = vmatprep.subr.bf16.mxu1 %v4562_v0  ;;  %v1362_v26 = vpop.permute.xlu1 %1361 }
 0x143   :  { %4326 = vmatpush3.bf16.msra.mxu0 %v4313_v9  ;;  %4007 = vmatprep.mubr.msk.f32.mxu0 %vm4563_vm0, %v4564_v1 }
 0x144   :  { %4327 = vmatprep.subr.bf16.mxu0 %v4562_v0 }
 0x145   :  { %4323 = vmatpush3.bf16.msra.mxu1 %v4788_v12 }
 0x146   :  { %4010 = vmatprep.subr.mxu1 %v4564_v1 }
 0x147   :  { %4329 = vmatpush3.bf16.msra.mxu0 %v4316_v13  ;;  %v1063_v13 = vld [vmem:[#allocation2] sm:$0xff] }
 0x148   :  { %4015 = vmatprep.subr.mxu0 %v4564_v1 }
 0x210   :  { %v437_v27 = vpop.f32.mrb[2].mxu1 }
 0x211   :  { %v361_v28 = vpop.f32.mrb[2].mxu0  ;;  %v3982_v29 = vpop.f32.mrb[3].mxu1 }
 0x212   :  { %v438_v30 = vadd.f32 %v437_v27, %v361_v28  ;;  %v3977_v31 = vpop.f32.mrb[3].mxu0  ;;  %v1439_v29 = vld [vmem:[#allocation4] sm:$0xff] }
 0x215   :  { %v514_v32 = vpop.f32.mrb[4].mxu0 }
 0x216   :  { %v518_v33 = vadd.f32 %v514_v32, %v438_v30  ;;  %v3987_v34 = vpop.f32.mrb[5].mxu0 }
 0x217   :  { %v1659_v34 = vld [vmem:[#allocation4 + $0x10] sm:$0xff] }
 0x218   :  { %v525_v36 = vadd.f32 %v523_v35, %v518_v33  ;;  %v3760_v35 = vld [vmem:[%s5157_s15 + $0x60] sm:$0xff] }
 0x21a   :  { %v526_v37 = vmax.f32 %v525_v36, 0.0  ;;  %v3761_v36 = vld [vmem:[%s5157_s15 + $0x68] sm:$0xff] }
 0x21c   :  { %3997 = vmatmul.mubr.msk.f32.vlgmr.msra.gmra.mrb[4].mxu1 %vm135_vm1, %v526_v37  ;;  %4008 = vmatmul.mubr.msk.f32.vlgmr.msra.gmra.mrb[6].mxu0 %vm135_vm1, %v526_v37 }
 0x21d   :  { %4012 = vmatprep.mubr.msk.f32.mxu1 %vm4563_vm0, %v4564_v1  ;;  %4017 = vmatprep.mubr.msk.f32.mxu0 %vm4563_vm0, %v4564_v1 }
 0x2ef   :  { %v596_v44 = vpop.f32.mrb[4].mxu1  ;;  %v667_v45 = vpop.f32.mrb[6].mxu0 }
 0x2f0   :  { %v3998_v46 = vpop.f32.mrb[5].mxu1  ;;  %v4009_v47 = vpop.f32.mrb[7].mxu0  ;;  %4011 = vmatpush3.msra.mxu1 %v667_v45  ;;  %4016 = vmatpush3.msra.mxu0 %v596_v44 }
 0x2f1   :  { %4013 = vmatmul.mubr.msk.f32.vlgmr.msra.gmra.mrb[6].mxu1 %vm673_vm4, %v3739_v42  ;;  %4018 = vmatmul.mubr.msk.f32.vlgmr.msra.gmra.mrb[8].mxu0 %vm673_vm4, %v600_v43 }
 0x2f2   :  { %4020 = vmatprep.subr.mxu1 %v4564_v1  ;;  %4022 = vmatprep.mubr.msk.f32.mxu1 %vm4563_vm0, %v4564_v1 }
 0x2f3   :  { %4021 = vmatpush3.msra.mxu1 %v526_v37  ;;  %4025 = vmatprep.subr.mxu0 %v4564_v1  ;;  %v4355_v37 = vpack.c.bf16 %v3761_v36, %v3760_v35 }
 0x2f4   :  { %4026 = vmatpush3.msk.msra.mxu0 %vm291_vm2, %v4796_v14  ;;  %4027 = vmatprep.mubr.msk.f32.mxu0 %vm4563_vm0, %v4564_v1 }
 0x2f5   :  { %4023 = vmatmul.mubr.msk.f32.vlgmr.msra.gmra.mrb[8].mxu1 %vm673_vm4, %v3742_v48  ;;  %4028 = vmatmul.mubr.msk.f32.vlgmr.msra.gmra.mrb[10].mxu0 %vm287_vm3, %v904_v49  ;;  %v1738_v49 = vpop.permute.xlu0 %1737 }
 0x2f6   :  { %4330 = vmatprep.subr.bf16.mxu1 %v4562_v0  ;;  %4336 = vmatprep.subr.bf16.mxu0 %v4562_v0 }
 0x2f7   :  { %4338 = vmatpush3.bf16.msra.mxu0 %v4770_v5  ;;  %4038 = vmatprep.mubr.msk.f32.mxu1 %vm4563_vm0, %v4564_v1 }
 0x2f8   :  { %4339 = vmatprep.subr.bf16.mxu0 %v4562_v0  ;;  %4049 = vmatprep.mubr.msk.f32.mxu0 %vm4563_vm0, %v4564_v1 }
 0x2f9   :  { %4332 = vmatpush3.bf16.msra.mxu1 %v4909_v52  ;;  %v2496_v36 = vpop.permute.xlu0 %2495 }
 0x2fa   :  { %4333 = vmatprep.subr.bf16.mxu1 %v4562_v0 }
 0x2fb   :  { %4341 = vmatpush3.bf16.msra.mxu0 %v4788_v12 }
 0x2fc   :  { %4057 = vmatprep.subr.mxu0 %v4564_v1 }
 0x2fd   :  { %4335 = vmatpush3.bf16.msra.mxu1 %v4919_v55 }
 0x2fe   :  { %4052 = vmatprep.subr.mxu1 %v4564_v1 }
 0x3c4   :  { %v743_v56 = vpop.f32.mrb[6].mxu1  ;;  %v816_v57 = vpop.f32.mrb[8].mxu0 }
 0x3c5   :  { %v817_v58 = vadd.f32 %v816_v57, %v743_v56  ;;  %v4014_v59 = vpop.f32.mrb[7].mxu1  ;;  %v4019_v60 = vpop.f32.mrb[9].mxu0  ;;  %v1821_v56 = vld [vmem:[#allocation6] sm:$0xff] }
 0x3c8   :  { %v891_v61 = vpop.f32.mrb[8].mxu1  ;;  %v980_v62 = vpop.f32.mrb[10].mxu0 }
 0x3c9   :  { %v895_v63 = vadd.f32 %v891_v61, %v817_v58  ;;  %v4024_v2 = vpop.f32.mrb[9].mxu1  ;;  %v4029_v3 = vpop.f32.mrb[11].mxu0  ;;  %v981_v8 = vadd.f32 %v980_v62, %v909_v6  ;;  %v2041_v61 = vld [vmem:[#allocation6 + $0x10] sm:$0xff] }
 0x3cb   :  { %v902_v7 = vadd.f32 %v900_v4, %v895_v63 }
 0x3cd   :  { %v903_v9 = vmax.f32 %v902_v7, 0.0 }
 0x3cf   :  { %v4923_v10 = vadd.f32 %v981_v8, %v903_v9  ;;  %v2120_v8 = vpop.permute.xlu1 %2119 }
 0x3d1   :  { %4039 = vmatmul.mubr.msk.f32.vlgmr.msra.gmra.mrb[10].mxu1 %vm135_vm1, %v4923_v10  ;;  %4050 = vmatmul.mubr.msk.f32.vlgmr.msra.gmra.mrb[12].mxu0 %vm135_vm1, %v4923_v10 }
 0x3d2   :  { %4054 = vmatprep.mubr.msk.f32.mxu1 %vm4563_vm0, %v4564_v1  ;;  %4059 = vmatprep.mubr.msk.f32.mxu0 %vm4563_vm0, %v4564_v1 }
 0x4a4   :  { %v1059_v14 = vpop.f32.mrb[10].mxu1  ;;  %v1130_v15 = vpop.f32.mrb[12].mxu0 }
 0x4a5   :  { %v4040_v16 = vpop.f32.mrb[11].mxu1  ;;  %v4051_v17 = vpop.f32.mrb[13].mxu0  ;;  %4053 = vmatpush3.msra.mxu1 %v1130_v15  ;;  %4058 = vmatpush3.msra.mxu0 %v1059_v14 }
 0x4a6   :  { %4055 = vmatmul.mubr.msk.f32.vlgmr.msra.gmra.mrb[12].mxu1 %vm673_vm4, %v1135_v11  ;;  %4060 = vmatmul.mubr.msk.f32.vlgmr.msra.gmra.mrb[14].mxu0 %vm673_vm4, %v1063_v13  ;;  %v2197_v11 = vld [vmem:[#allocation7] sm:$0xff]  ;;  %v2417_v17 = vld [vmem:[#allocation7 + $0x10] sm:$0xff] }
 0x4a7   :  { %4062 = vmatprep.subr.mxu1 %v4564_v1  ;;  %4064 = vmatprep.mubr.msk.f32.mxu1 %vm4563_vm0, %v4564_v1 }
 0x4a8   :  { %4063 = vmatpush3.msra.mxu1 %v4923_v10  ;;  %4342 = vmatprep.subr.bf16.mxu0 %v4562_v0 }
 0x4a9   :  { %4348 = vmatprep.subr.bf16.mxu1 %v4562_v0  ;;  %4344 = vmatpush3.bf16.msra.mxu0 %v4909_v52 }
 0x4aa   :  { %4065 = vmatmul.mubr.msk.f32.vlgmr.msra.gmra.mrb[14].mxu1 %vm673_vm4, %v1283_v18  ;;  %4345 = vmatprep.subr.bf16.mxu0 %v4562_v0  ;;  %v2500_v18 = vld [vmem:[#allocation9] sm:$0xff] }
 0x4ab   :  { %4350 = vmatpush3.bf16.msra.mxu1 %v4770_v5  ;;  %4075 = vmatprep.mubr.msk.f32.mxu0 %vm4563_vm0, %v4564_v1 }
 0x4ac   :  { %4351 = vmatprep.subr.bf16.mxu1 %v4562_v0  ;;  %4086 = vmatprep.mubr.msk.f32.mxu1 %vm4563_vm0, %v4564_v1 }
 0x4ad   :  { %4347 = vmatpush3.bf16.msra.mxu0 %v4919_v55 }
 0x4ae   :  { %4089 = vmatprep.subr.mxu0 %v4564_v1 }
 0x4af   :  { %4353 = vmatpush3.bf16.msra.mxu1 %v4788_v12  ;;  %v1511_v12 = vld [vmem:[#allocation4 + $0x8] sm:$0xff] }
 0x4b0   :  { %4094 = vmatprep.subr.mxu1 %v4564_v1 }
 0x579   :  { %v1205_v19 = vpop.f32.mrb[12].mxu1  ;;  %v1278_v20 = vpop.f32.mrb[14].mxu0 }
 0x57a   :  { %v1279_v21 = vadd.f32 %v1278_v20, %v1205_v19  ;;  %v4056_v5 = vpop.f32.mrb[13].mxu1  ;;  %v4061_v22 = vpop.f32.mrb[15].mxu0  ;;  %v2501_v19 = vld [vmem:[#allocation9 + $0x8] sm:$0xff]  ;;  %v2579_v20 = vld [vmem:[#allocation9 + $0x20] sm:$0xff] }
 0x57b   :  { %v2580_v5 = vld [vmem:[#allocation9 + $0x28] sm:$0xff] }
 0x57c   :  { %v4385_v22 = vpack.c.bf16 %v2580_v5, %v2579_v20  ;;  %v3255_v20 = vld [vmem:[#allocation9 + $0xa0] sm:$0xff] }
 0x57d   :  { %v1353_v23 = vpop.f32.mrb[14].mxu1  ;;  %v3786_v5 = vld [vmem:[%s5158_s16 + $0x20] sm:$0xff] }
 0x57e   :  { %v1357_v24 = vadd.f32 %v1353_v23, %v1279_v21  ;;  %v4066_v25 = vpop.f32.mrb[15].mxu1  ;;  %v4379_v21 = vpack.c.bf16 %v2501_v19, %v2500_v18  ;;  %v2502_v23 = vld [vmem:[#allocation9 + $0x10] sm:$0xff] }
 0x57f   :  { %v2581_v25 = vld [vmem:[#allocation9 + $0x30] sm:$0xff] }
 0x580   :  { %v1364_v27 = vadd.f32 %v1362_v26, %v1357_v24  ;;  %v2503_v24 = vld [vmem:[#allocation9 + $0x18] sm:$0xff] }
 0x581   :  { %v4382_v26 = vpack.c.bf16 %v2503_v24, %v2502_v23  ;;  %v3257_v24 = vld [vmem:[#allocation9 + $0xb0] sm:$0xff] }
 0x582   :  { %v1365_v28 = vmax.f32 %v1364_v27, 0.0  ;;  %v2582_v27 = vld [vmem:[#allocation9 + $0x38] sm:$0xff] }
 0x584   :  { %4076 = vmatmul.mubr.msk.f32.vlgmr.msra.gmra.mrb[16].mxu0 %vm135_vm1, %v1365_v28  ;;  %4087 = vmatmul.mubr.msk.f32.vlgmr.msra.gmra.mrb[16].mxu1 %vm135_vm1, %v1365_v28 }
 0x585   :  { %4091 = vmatprep.mubr.msk.f32.mxu0 %vm4563_vm0, %v4564_v1  ;;  %4096 = vmatprep.mubr.msk.f32.mxu1 %vm4563_vm0, %v4564_v1 }
 0x657   :  { %v1435_v30 = vpop.f32.mrb[16].mxu0  ;;  %v1506_v31 = vpop.f32.mrb[16].mxu1 }
 0x658   :  { %v4077_v32 = vpop.f32.mrb[17].mxu0  ;;  %v4088_v33 = vpop.f32.mrb[17].mxu1  ;;  %4090 = vmatpush3.msra.mxu0 %v1506_v31  ;;  %4095 = vmatpush3.msra.mxu1 %v1435_v30 }
 0x659   :  { %4092 = vmatmul.mubr.msk.f32.vlgmr.msra.gmra.mrb[18].mxu0 %vm673_vm4, %v1511_v12  ;;  %4097 = vmatmul.mubr.msk.f32.vlgmr.msra.gmra.mrb[18].mxu1 %vm673_vm4, %v1439_v29 }
 0x65a   :  { %4099 = vmatprep.subr.mxu0 %v4564_v1  ;;  %4101 = vmatprep.mubr.msk.f32.mxu0 %vm4563_vm0, %v4564_v1 }
 0x65b   :  { %4100 = vmatpush3.msra.mxu0 %v1365_v28  ;;  %4354 = vmatprep.subr.bf16.mxu1 %v4562_v0  ;;  %v4388_v28 = vpack.c.bf16 %v2582_v27, %v2581_v25  ;;  %v3258_v25 = vld [vmem:[#allocation9 + $0xb8] sm:$0xff] }
 0x65c   :  { %4360 = vmatprep.subr.bf16.mxu0 %v4562_v0  ;;  %4112 = vmatprep.mubr.msk.f32.mxu1 %vm4563_vm0, %v4564_v1  ;;  %v4412_v27 = vpack.c.bf16 %v3258_v25, %v3257_v24 }
 0x65d   :  { %4102 = vmatmul.mubr.msk.f32.vlgmr.msra.gmra.mrb[20].mxu0 %vm673_vm4, %v1659_v34  ;;  %4356 = vmatpush3.bf16.msra.mxu1 %v4355_v37 }
 0x65e   :  { %4362 = vmatpush3.bf16.msra.mxu0 %v4909_v52  ;;  %4123 = vmatprep.mubr.msk.f32.mxu0 %vm4563_vm0, %v4564_v1 }
 0x65f   :  { %4363 = vmatprep.subr.bf16.mxu0 %v4562_v0  ;;  %4357 = vmatprep.subr.bf16.mxu1 %v4562_v0 }
 0x661   :  { %4359 = vmatpush3.bf16.msra.mxu1 %v4358_v40 }
 0x662   :  { %4365 = vmatpush3.bf16.msra.mxu0 %v4919_v55  ;;  %4126 = vmatprep.subr.mxu1 %v4564_v1 }
 0x663   :  { %4131 = vmatprep.subr.mxu0 %v4564_v1 }
 0x72c   :  { %v1581_v41 = vpop.f32.mrb[18].mxu0  ;;  %v1654_v42 = vpop.f32.mrb[18].mxu1 }
 0x72d   :  { %v1655_v43 = vadd.f32 %v1654_v42, %v1581_v41  ;;  %v4093_v44 = vpop.f32.mrb[19].mxu0  ;;  %v4098_v45 = vpop.f32.mrb[19].mxu1  ;;  %v3776_v41 = vld [vmem:[%s5158_s16 + $0x8] sm:$0xff] }
 0x72e   :  { %v2577_v45 = vld [vmem:[%s5158_s16] sm:$0xff] }
 0x730   :  { %v1729_v46 = vpop.f32.mrb[20].mxu0 }
 0x731   :  { %v1733_v47 = vadd.f32 %v1729_v46, %v1655_v43  ;;  %v4103_v48 = vpop.f32.mrb[21].mxu0  ;;  %v2804_v46 = vld [vmem:[#allocation9 + $0x50] sm:$0xff] }
 0x733   :  { %v1740_v50 = vadd.f32 %v1738_v49, %v1733_v47  ;;  %v2805_v47 = vld [vmem:[#allocation9 + $0x58] sm:$0xff] }
 0x735   :  { %v1741_v51 = vmax.f32 %v1740_v50, 0.0  ;;  %v4394_v50 = vpack.c.bf16 %v2805_v47, %v2804_v46 }
 0x737   :  { %v4991_v53 = vadd.f32 %v1741_v51, %v4923_v10 }
 0x739   :  { %4113 = vmatmul.mubr.msk.f32.vlgmr.msra.gmra.mrb[20].mxu1 %vm135_vm1, %v4991_v53  ;;  %4124 = vmatmul.mubr.msk.f32.vlgmr.msra.gmra.mrb[22].mxu0 %vm135_vm1, %v4991_v53 }
 0x73a   :  { %4128 = vmatprep.mubr.msk.f32.mxu1 %vm4563_vm0, %v4564_v1  ;;  %4133 = vmatprep.mubr.msk.f32.mxu0 %vm4563_vm0, %v4564_v1 }
 0x80c   :  { %v1817_v57 = vpop.f32.mrb[20].mxu1  ;;  %v1888_v58 = vpop.f32.mrb[22].mxu0 }
 0x80d   :  { %v4114_v59 = vpop.f32.mrb[21].mxu1  ;;  %v4125_v60 = vpop.f32.mrb[23].mxu0  ;;  %4127 = vmatpush3.msra.mxu1 %v1888_v58  ;;  %4132 = vmatpush3.msra.mxu0 %v1817_v57  ;;  %v2953_v58 = vld [vmem:[#allocation9 + $0x60] sm:$0xff] }
 0x80e   :  { %4129 = vmatmul.mubr.msk.f32.vlgmr.msra.gmra.mrb[22].mxu1 %vm673_vm4, %v1893_v54  ;;  %4134 = vmatmul.mubr.msk.f32.vlgmr.msra.gmra.mrb[24].mxu0 %vm673_vm4, %v1821_v56  ;;  %v2954_v59 = vld [vmem:[#allocation9 + $0x68] sm:$0xff]  ;;  %v3780_v60 = vld [vmem:[%s5158_s16 + $0x10] sm:$0xff] }
 0x80f   :  { %4136 = vmatprep.subr.mxu1 %v4564_v1  ;;  %4138 = vmatprep.mubr.msk.f32.mxu1 %vm4563_vm0, %v4564_v1 }
 0x810   :  { %4137 = vmatpush3.msra.mxu1 %v4991_v53  ;;  %4366 = vmatprep.subr.bf16.mxu0 %v4562_v0 }
 0x811   :  { %4372 = vmatprep.subr.bf16.mxu1 %v4562_v0  ;;  %4368 = vmatpush3.bf16.msra.mxu0 %v4355_v37 }
 0x812   :  { %4139 = vmatmul.mubr.msk.f32.vlgmr.msra.gmra.mrb[24].mxu1 %vm673_vm4, %v2041_v61  ;;  %4369 = vmatprep.subr.bf16.mxu0 %v4562_v0  ;;  %v4397_v61 = vpack.c.bf16 %v2954_v59, %v2953_v58 }
 0x813   :  { %4374 = vmatpush3.bf16.msra.mxu1 %v4909_v52  ;;  %4149 = vmatprep.mubr.msk.f32.mxu0 %vm4563_vm0, %v4564_v1 }
 0x814   :  { %4375 = vmatprep.subr.bf16.mxu1 %v4562_v0  ;;  %4160 = vmatprep.mubr.msk.f32.mxu1 %vm4563_vm0, %v4564_v1 }
 0x815   :  { %4371 = vmatpush3.bf16.msra.mxu0 %v4358_v40  ;;  %v2803_v40 = vld [vmem:[#allocation9 + $0x48] sm:$0xff] }
 0x816   :  { %4163 = vmatprep.subr.mxu0 %v4564_v1  ;;  %v4391_v42 = vpack.c.bf16 %v2803_v40, %v2802_v39 }
 0x817   :  { %4377 = vmatpush3.bf16.msra.mxu1 %v4919_v55  ;;  %v2269_v55 = vld [vmem:[#allocation7 + $0x8] sm:$0xff] }
 0x818   :  { %4168 = vmatprep.subr.mxu1 %v4564_v1 }
 0x8e1   :  { %v1963_v62 = vpop.f32.mrb[22].mxu1  ;;  %v2036_v63 = vpop.f32.mrb[24].mxu0 }
 0x8e2   :  { %v2037_v2 = vadd.f32 %v2036_v63, %v1963_v62  ;;  %v4130_v3 = vpop.f32.mrb[23].mxu1  ;;  %v4135_v52 = vpop.f32.mrb[25].mxu0  ;;  %v2955_v63 = vld [vmem:[#allocation9 + $0x70] sm:$0xff] }
 0x8e5   :  { %v2111_v4 = vpop.f32.mrb[24].mxu1 }
 0x8e6   :  { %v2115_v6 = vadd.f32 %v2111_v4, %v2037_v2  ;;  %v4140_v7 = vpop.f32.mrb[25].mxu1  ;;  %v2956_v2 = vld [vmem:[#allocation9 + $0x78] sm:$0xff] }
 0x8e7   :  { %v4400_v52 = vpack.c.bf16 %v2956_v2, %v2955_v63 }
 0x8e8   :  { %v2122_v9 = vadd.f32 %v2120_v8, %v2115_v6  ;;  %v3104_v8 = vld [vmem:[#allocation9 + $0x80] sm:$0xff] }
 0x8ea   :  { %v2123_v10 = vmax.f32 %v2122_v9, 0.0  ;;  %v3105_v9 = vld [vmem:[#allocation9 + $0x88] sm:$0xff] }
 0x8ec   :  { %4150 = vmatmul.mubr.msk.f32.vlgmr.msra.gmra.mrb[26].mxu0 %vm135_vm1, %v2123_v10  ;;  %4161 = vmatmul.mubr.msk.f32.vlgmr.msra.gmra.mrb[26].mxu1 %vm135_vm1, %v2123_v10 }
 0x8ed   :  { %4165 = vmatprep.mubr.msk.f32.mxu0 %vm4563_vm0, %v4564_v1  ;;  %4170 = vmatprep.mubr.msk.f32.mxu1 %vm4563_vm0, %v4564_v1 }
 0x9bf   :  { %v2193_v13 = vpop.f32.mrb[26].mxu0  ;;  %v2264_v14 = vpop.f32.mrb[26].mxu1 }
 0x9c0   :  { %v4151_v15 = vpop.f32.mrb[27].mxu0  ;;  %v4162_v16 = vpop.f32.mrb[27].mxu1  ;;  %4164 = vmatpush3.msra.mxu0 %v2264_v14  ;;  %4169 = vmatpush3.msra.mxu1 %v2193_v13  ;;  %v3106_v13 = vld [vmem:[#allocation9 + $0x90] sm:$0xff]  ;;  %v3107_v14 = vld [vmem:[#allocation9 + $0x98] sm:$0xff] }
 0x9c1   :  { %4166 = vmatmul.mubr.msk.f32.vlgmr.msra.gmra.mrb[28].mxu0 %vm673_vm4, %v2269_v55  ;;  %4171 = vmatmul.mubr.msk.f32.vlgmr.msra.gmra.mrb[28].mxu1 %vm673_vm4, %v2197_v11  ;;  %v4403_v55 = vpack.c.bf16 %v3105_v9, %v3104_v8  ;;  %v4406_v16 = vpack.c.bf16 %v3107_v14, %v3106_v13 }
 0x9c2   :  { %4173 = vmatprep.subr.mxu0 %v4564_v1  ;;  %4175 = vmatprep.mubr.msk.f32.mxu0 %vm4563_vm0, %v4564_v1 }
 0x9c3   :  { %4174 = vmatpush3.msra.mxu0 %v2123_v10  ;;  %4378 = vmatprep.subr.bf16.mxu1 %v4562_v0  ;;  %v3783_v10 = vld [vmem:[%s5158_s16 + $0x18] sm:$0xff] }
 0x9c4   :  { %4384 = vmatprep.subr.bf16.mxu0 %v4562_v0  ;;  %4186 = vmatprep.mubr.msk.f32.mxu1 %vm4563_vm0, %v4564_v1 }
 0x9c5   :  { %4176 = vmatmul.mubr.msk.f32.vlgmr.msra.gmra.mrb[30].mxu0 %vm673_vm4, %v2417_v17  ;;  %4380 = vmatpush3.bf16.msra.mxu1 %v4379_v21  ;;  %v3256_v21 = vld [vmem:[#allocation9 + $0xa8] sm:$0xff] }
 0x9c6   :  { %4197 = vmatprep.mubr.msk.f32.mxu0 %vm4563_vm0, %v4564_v1  ;;  %4386 = vmatpush3.bf16.msra.mxu0 %v4385_v22  ;;  %v4409_v22 = vpack.c.bf16 %v3256_v21, %v3255_v20 }
 0x9c7   :  { %4381 = vmatprep.subr.bf16.mxu1 %v4562_v0  ;;  %4387 = vmatprep.subr.bf16.mxu0 %v4562_v0 }
 0x9c9   :  { %4383 = vmatpush3.bf16.msra.mxu1 %v4382_v26 }
 0x9ca   :  { %4389 = vmatpush3.bf16.msra.mxu0 %v4388_v28  ;;  %4200 = vmatprep.subr.mxu1 %v4564_v1 }
 0x9cb   :  { %4205 = vmatprep.subr.mxu0 %v4564_v1 }
 0xa94   :  { %v2339_v12 = vpop.f32.mrb[28].mxu0  ;;  %v2412_v29 = vpop.f32.mrb[28].mxu1 }
 0xa95   :  { %v2413_v30 = vadd.f32 %v2412_v29, %v2339_v12  ;;  %v4167_v31 = vpop.f32.mrb[29].mxu0  ;;  %v4172_v32 = vpop.f32.mrb[29].mxu1 }
 0xa96   :  { %v3407_v31 = vld [vmem:[#allocation9 + $0xc8] sm:$0xff] }
 0xa97   :  { %v3789_v32 = vld [vmem:[%s5158_s16 + $0x28] sm:$0xff] }
 0xa98   :  { %v2487_v33 = vpop.f32.mrb[30].mxu0 }
 0xa99   :  { %v2491_v34 = vadd.f32 %v2487_v33, %v2413_v30  ;;  %v4177_v35 = vpop.f32.mrb[31].mxu0  ;;  %v3406_v30 = vld [vmem:[#allocation9 + $0xc0] sm:$0xff] }
 0xa9a   :  { %v4415_v33 = vpack.c.bf16 %v3407_v31, %v3406_v30  ;;  %v3408_v35 = vld [vmem:[#allocation9 + $0xd0] sm:$0xff] }
 0xa9b   :  { %v2498_v37 = vadd.f32 %v2496_v36, %v2491_v34  ;;  %v3409_v36 = vld [vmem:[#allocation9 + $0xd8] sm:$0xff] }
 0xa9c   :  { %v4418_v39 = vpack.c.bf16 %v3409_v36, %v3408_v35 }
 0xa9d   :  { %v5043_v38 = vadd.f32 %v2498_v37, %v4991_v53 }
 0xa9f   :  { %4187 = vmatmul.mubr.msk.f32.vlgmr.msra.gmra.mrb[30].mxu1 %vm135_vm1, %v5043_v38  ;;  %4198 = vmatmul.mubr.msk.f32.vlgmr.msra.gmra.mrb[32].mxu0 %vm135_vm1, %v5043_v38 }
 0xaa0   :  { %4202 = vmatprep.mubr.msk.f32.mxu1 %vm4563_vm0, %v4564_v1  ;;  %4207 = vmatprep.mubr.msk.f32.mxu0 %vm4563_vm0, %v4564_v1 }
 0xb72   :  { %v2573_v43 = vpop.f32.mrb[30].mxu1  ;;  %v2649_v44 = vpop.f32.mrb[32].mxu0 }
 0xb73   :  { %v4188_v48 = vpop.f32.mrb[31].mxu1  ;;  %v4199_v49 = vpop.f32.mrb[33].mxu0  ;;  %4201 = vmatpush3.msra.mxu1 %v2649_v44  ;;  %4206 = vmatpush3.msra.mxu0 %v2573_v43  ;;  %v3557_v43 = vld [vmem:[#allocation9 + $0xe0] sm:$0xff]  ;;  %v3558_v44 = vld [vmem:[#allocation9 + $0xe8] sm:$0xff] }
 0xb74   :  { %4203 = vmatmul.mubr.msk.f32.vlgmr.msra.gmra.mrb[32].mxu1 %vm673_vm4, %v3776_v41  ;;  %4390 = vmatprep.subr.bf16.mxu1 %v4562_v0  ;;  %v4421_v46 = vpack.c.bf16 %v3558_v44, %v3557_v43  ;;  %v3559_v48 = vld [vmem:[#allocation9 + $0xf0] sm:$0xff]  ;;  %v3560_v49 = vld [vmem:[#allocation9 + $0xf8] sm:$0xff] }
 0xb75   :  { %4208 = vmatmul.mubr.msk.f32.vlgmr.msra.gmra.mrb[34].mxu0 %vm673_vm4, %v2577_v45  ;;  %4392 = vmatpush3.bf16.msra.mxu1 %v4391_v42  ;;  %v3792_v45 = vld [vmem:[%s5158_s16 + $0x30] sm:$0xff] }
 0xb76   :  { %4393 = vmatprep.subr.bf16.mxu1 %v4562_v0  ;;  %4218 = vmatprep.mubr.msk.f32.mxu1 %vm4563_vm0, %v4564_v1 }
 0xb77   :  { %4221 = vmatprep.subr.mxu0 %v4564_v1  ;;  %4223 = vmatprep.mubr.msk.f32.mxu0 %vm4563_vm0, %v4564_v1 }
 0xb79   :  { %4395 = vmatpush3.bf16.msra.mxu1 %v4394_v50 }
 0xb7a   :  { %4237 = vmatprep.subr.mxu1 %v4564_v1 }
 0xb7c   :  { %4219 = vmatmul.mubr.msk.f32.vlgmr.msra.gmra.mrb[34].mxu1 %vm135_vm1, %v5043_v38 }
 0xb7d   :  { %4239 = vmatprep.mubr.msk.f32.mxu1 %vm4563_vm0, %v4564_v1 }
 0xc47   :  { %v2724_v51 = vpop.f32.mrb[32].mxu1 }
 0xc48   :  { %v4204_v53 = vpop.f32.mrb[33].mxu1  ;;  %v2797_v54 = vpop.f32.mrb[34].mxu0 }
 0xc49   :  { %v2798_v56 = vadd.f32 %v2797_v54, %v2724_v51  ;;  %v4209_v57 = vpop.f32.mrb[35].mxu0  ;;  %v4424_v51 = vpack.c.bf16 %v3560_v49, %v3559_v48 }
 0xc4a   :  { %v3795_v57 = vld [vmem:[%s5158_s16 + $0x38] sm:$0xff] }
 0xc4f   :  { %v2872_v62 = vpop.f32.mrb[34].mxu1 }
 0xc50   :  { %v4220_v3 = vpop.f32.mrb[35].mxu1  ;;  %4222 = vmatpush3.msra.mxu0 %v2872_v62 }
 0xc51   :  { %4224 = vmatmul.mubr.msk.f32.vlgmr.msra.gmra.mrb[36].mxu0 %vm673_vm4, %v3780_v60  ;;  %4396 = vmatprep.subr.bf16.mxu0 %v4562_v0 }
 0xc52   :  { %4398 = vmatpush3.bf16.msra.mxu0 %v4397_v61  ;;  %4234 = vmatprep.mubr.msk.f32.mxu0 %vm4563_vm0, %v4564_v1 }
 0xc53   :  { %4399 = vmatprep.subr.bf16.mxu0 %v4562_v0 }
 0xc56   :  { %4401 = vmatpush3.bf16.msra.mxu0 %v4400_v52 }
 0xc57   :  { %4253 = vmatprep.subr.mxu0 %v4564_v1 }
 0xc59   :  { %4235 = vmatmul.mubr.msk.f32.vlgmr.msra.gmra.mrb[38].mxu0 %vm135_vm1, %v5043_v38 }
 0xc5a   :  { %4255 = vmatprep.mubr.msk.f32.mxu0 %vm4563_vm0, %v4564_v1 }
 0xd24   :  { %v2947_v4 = vpop.f32.mrb[36].mxu0 }
 0xd25   :  { %v2951_v6 = vadd.f32 %v2947_v4, %v2798_v56  ;;  %v4225_v7 = vpop.f32.mrb[37].mxu0 }
 0xd2c   :  { %v3023_v11 = vpop.f32.mrb[38].mxu0 }
 0xd2d   :  { %v4236_v15 = vpop.f32.mrb[39].mxu0  ;;  %4238 = vmatpush3.msra.mxu1 %v3023_v11 }
 0xd2e   :  { %4240 = vmatmul.mubr.msk.f32.vlgmr.msra.gmra.mrb[36].mxu1 %vm673_vm4, %v3783_v10  ;;  %4402 = vmatprep.subr.bf16.mxu1 %v4562_v0 }
 0xd2f   :  { %4404 = vmatpush3.bf16.msra.mxu1 %v4403_v55  ;;  %4250 = vmatprep.mubr.msk.f32.mxu1 %vm4563_vm0, %v4564_v1 }
 0xd30   :  { %4405 = vmatprep.subr.bf16.mxu1 %v4562_v0 }
 0xd33   :  { %4407 = vmatpush3.bf16.msra.mxu1 %v4406_v16 }
 0xd34   :  { %4269 = vmatprep.subr.mxu1 %v4564_v1 }
 0xd36   :  { %4251 = vmatmul.mubr.msk.f32.vlgmr.msra.gmra.mrb[38].mxu1 %vm135_vm1, %v5043_v38 }
 0xd37   :  { %4271 = vmatprep.mubr.msk.f32.mxu1 %vm4563_vm0, %v4564_v1 }
 0xe01   :  { %v3098_v17 = vpop.f32.mrb[36].mxu1 }
 0xe02   :  { %v3102_v18 = vadd.f32 %v3098_v17, %v2951_v6  ;;  %v4241_v19 = vpop.f32.mrb[37].mxu1 }
 0xe09   :  { %v3174_v23 = vpop.f32.mrb[38].mxu1 }
 0xe0a   :  { %v4252_v26 = vpop.f32.mrb[39].mxu1  ;;  %4254 = vmatpush3.msra.mxu0 %v3174_v23 }
 0xe0b   :  { %4256 = vmatmul.mubr.msk.f32.vlgmr.msra.gmra.mrb[40].mxu0 %vm673_vm4, %v3786_v5  ;;  %4408 = vmatprep.subr.bf16.mxu0 %v4562_v0 }
 0xe0c   :  { %4410 = vmatpush3.bf16.msra.mxu0 %v4409_v22  ;;  %4266 = vmatprep.mubr.msk.f32.mxu0 %vm4563_vm0, %v4564_v1 }
 0xe0d   :  { %4411 = vmatprep.subr.bf16.mxu0 %v4562_v0 }
 0xe10   :  { %4413 = vmatpush3.bf16.msra.mxu0 %v4412_v27 }
 0xe11   :  { %4285 = vmatprep.subr.mxu0 %v4564_v1 }
 0xe13   :  { %4267 = vmatmul.mubr.msk.f32.vlgmr.msra.gmra.mrb[42].mxu0 %vm135_vm1, %v5043_v38 }
 0xe14   :  { %4287 = vmatprep.mubr.msk.f32.mxu0 %vm4563_vm0, %v4564_v1 }
 0xede   :  { %v3249_v28 = vpop.f32.mrb[40].mxu0 }
 0xedf   :  { %v3253_v12 = vadd.f32 %v3249_v28, %v3102_v18  ;;  %v4257_v29 = vpop.f32.mrb[41].mxu0 }
 0xee6   :  { %v3325_v34 = vpop.f32.mrb[42].mxu0 }
 0xee7   :  { %v4268_v37 = vpop.f32.mrb[43].mxu0  ;;  %4270 = vmatpush3.msra.mxu1 %v3325_v34 }
 0xee8   :  { %4272 = vmatmul.mubr.msk.f32.vlgmr.msra.gmra.mrb[40].mxu1 %vm673_vm4, %v3789_v32  ;;  %4414 = vmatprep.subr.bf16.mxu1 %v4562_v0 }
 0xee9   :  { %4416 = vmatpush3.bf16.msra.mxu1 %v4415_v33  ;;  %4282 = vmatprep.mubr.msk.f32.mxu1 %vm4563_vm0, %v4564_v1 }
 0xeea   :  { %4417 = vmatprep.subr.bf16.mxu1 %v4562_v0 }
 0xeed   :  { %4419 = vmatpush3.bf16.msra.mxu1 %v4418_v39 }
 0xeee   :  { %4301 = vmatprep.subr.mxu1 %v4564_v1 }
 0xef0   :  { %4283 = vmatmul.mubr.msk.f32.vlgmr.msra.gmra.mrb[42].mxu1 %vm135_vm1, %v5043_v38 }
 0xef1   :  { %4303 = vmatprep.mubr.msk.f32.mxu1 %vm4563_vm0, %v4564_v1 }
 0xfbb   :  { %v3400_v40 = vpop.f32.mrb[40].mxu1 }
 0xfbc   :  { %v3404_v41 = vadd.f32 %v3400_v40, %v3253_v12  ;;  %v4273_v42 = vpop.f32.mrb[41].mxu1 }
 0xfc3   :  { %v3476_v47 = vpop.f32.mrb[42].mxu1 }
 0xfc4   :  { %v4284_v50 = vpop.f32.mrb[43].mxu1  ;;  %4286 = vmatpush3.msra.mxu0 %v3476_v47 }
 0xfc5   :  { %4288 = vmatmul.mubr.msk.f32.vlgmr.msra.gmra.mrb[44].mxu0 %vm673_vm4, %v3792_v45  ;;  %4420 = vmatprep.subr.bf16.mxu0 %v4562_v0 }
 0xfc6   :  { %4422 = vmatpush3.bf16.msra.mxu0 %v4421_v46  ;;  %4298 = vmatprep.mubr.msk.f32.mxu0 %vm4563_vm0, %v4564_v1 }
 0xfc7   :  { %4423 = vmatprep.subr.bf16.mxu0 %v4562_v0  ;;  %v3711_v0 = vpop.permute.xlu1 %3710 }
 0xfca   :  { %4425 = vmatpush3.bf16.msra.mxu0 %v4424_v51 }
 0xfcd   :  { %4299 = vmatmul.mubr.msk.f32.vlgmr.msra.gmra.mrb[46].mxu0 %vm135_vm1, %v5043_v38 }
0x1098   :  { %v3551_v53 = vpop.f32.mrb[44].mxu0 }
0x1099   :  { %v3555_v54 = vadd.f32 %v3551_v53, %v3404_v41  ;;  %v4289_v56 = vpop.f32.mrb[45].mxu0 }
0x10a0   :  { %v3627_v58 = vpop.f32.mrb[46].mxu0 }
0x10a1   :  { %v4300_v59 = vpop.f32.mrb[47].mxu0  ;;  %4302 = vmatpush3.msra.mxu1 %v3627_v58 }
0x10a2   :  { %4304 = vmatmul.mubr.msk.f32.vlgmr.msra.gmra.mrb[44].mxu1 %vm673_vm4, %v3795_v57 }
0x1175   :  { %v3702_v60 = vpop.f32.mrb[44].mxu1 }
0x1176   :  { %v3706_v1 = vadd.f32 %v3702_v60, %v3555_v54  ;;  %v4305_v61 = vpop.f32.mrb[45].mxu1 }
0x1178   :  { %v3713_v62 = vadd.f32 %v3711_v0, %v3706_v1 }
0x117a   :  { %3715 = vst.msk [vmem:[%s5161_s19] sm:$0xff] %vm3714_vm5, %v3713_v62 }
0x117b   :  { %3720 = vsyncpa [#allocation3], 1 }
0x117c   :  { %3721 = vsyncpa [#allocation5], 1 }
0x117d   :  { %3722 = vsyncpa [#allocation8], 1 }

</bundles_post_ra>
